<compile_context>
chip_gen: v5e
topology: v5e:2x2
jax: 0.10.0
libtpu: 0.0.40
codegen_flags: <defaults>
</compile_context>

<pallas_src>
import math

import jax
import jax.numpy as jnp
from jax.experimental import pallas as pl
from jax.experimental.pallas import tpu as pltpu


def _round_up(x, m):
    return (x + m - 1) // m * m


def symmetric_tensor_product(x0, w1, w2, c0):
    """x0: (batch, x0_size) -> out: (batch, x1_size)."""
    batch, d_in = x0.shape
    d_out = w1.shape[0]
    assert w1.shape == (d_out, d_in)
    assert w2.shape == (d_in, d_in, d_out)
    assert c0.shape == (d_out,)

    dtype = x0.dtype
    itemsize = jnp.dtype(dtype).itemsize
    sub = {4: 8, 2: 16, 1: 32}.get(itemsize, 8)   # sublane multiple for this dtype

    da = d_in + 1                       # augmented feature size ([1, x])
    d_out_p = _round_up(d_out, 128)     # lane-dense output width

    # Per-MXU-pass N: two i-slabs (N=256) on v6e/v7x, one slab (N=128) on v5e.
    try:
        kind = jax.devices()[0].device_kind.lower()
    except Exception:
        kind = ""
    target_n = 128 if "v5" in kind else 256
    group = max(1, min(target_n // d_out_p, da))
    n_groups = math.ceil(da / group)
    da_g = n_groups * group             # padded augmented-i count
    dk = _round_up(da_g, sub)           # sublane-aligned contraction (K) size

    # Batch tile: up to 512 rows, >= 2 grid steps when the batch allows (keeps both
    # v7x TensorCores busy), sublane-aligned; compute runs in 128-row sub-blocks.
    n_steps = max(2, math.ceil(batch / 512)) if batch > sub else 1
    tb = min(512, _round_up(math.ceil(batch / n_steps), sub))
    batch_p = _round_up(batch, tb)
    row_blocks = [(r0, min(128, tb - r0)) for r0 in range(0, tb, 128)]

    # --- wrapper-side weight packing (pure JAX, done once; math_dtype = f32) -----
    wa = jnp.zeros((da_g, dk, d_out_p), jnp.float32)                 # Wa[i, j, o]
    wa = wa.at[0, 0, :d_out].set(jnp.asarray(c0, jnp.float32))       # degree 0
    wa = wa.at[0, 1:da, :d_out].set(jnp.asarray(w1, jnp.float32).T)  # degree 1
    wa = wa.at[1:da, 1:da, :d_out].set(jnp.asarray(w2, jnp.float32))  # degree 2
    # W_r[j, i*d_out_p + o] = Wa[i, j, o]  (pre-transposed; no in-kernel relayout).
    # Cast only narrows coefficients if the inputs themselves are sub-f32.
    w_r = jnp.transpose(wa, (1, 0, 2)).reshape(dk, da_g * d_out_p).astype(dtype)

    # --- wrapper-side input prep --------------------------------------------------
    x_aug = jnp.concatenate([jnp.ones((batch, 1), dtype), x0], axis=1)    # (batch, da)
    x_aug = jnp.pad(x_aug, ((0, batch_p - batch), (0, dk - da)))          # (batch_p, dk)

    # --- kernel -------------------------------------------------------------------
    def kernel(x_ref, w_ref, o_ref):
        for r0, rs in row_blocks:                          # 128-row compute blocks
            x = x_ref[r0:r0 + rs, :]                       # (rs, dk), input dtype
            acc = jnp.zeros((rs, d_out_p), jnp.float32)
            for g in range(n_groups):
                lo = g * group * d_out_p
                # One MXU pass over `group` i-slabs, f32 accumulate.
                z = jnp.dot(x, w_ref[:, lo:lo + group * d_out_p],
                            preferred_element_type=jnp.float32)   # (rs, group*Dp)
                for u in range(group):                     # fused VPU epilogue
                    i = g * group + u
                    acc = acc + (x[:, i:i + 1].astype(jnp.float32)
                                 * z[:, u * d_out_p:(u + 1) * d_out_p])
            o_ref[r0:r0 + rs, :] = acc.astype(o_ref.dtype)

    w_bytes = dk * da_g * d_out_p * itemsize
    x_bytes = tb * dk * itemsize
    o_bytes = tb * d_out_p * itemsize
    cost = pl.CostEstimate(
        flops=2 * batch_p * dk * da_g * d_out_p + 2 * batch_p * da_g * d_out_p,
        transcendentals=0,
        bytes_accessed=batch_p * dk * itemsize + w_bytes + batch_p * d_out_p * itemsize,
    )

    def make_call(single_buffer_w):
        if single_buffer_w:
            # Grid-invariant packed weights: single-buffer to halve their VMEM cost.
            w_spec = pl.BlockSpec((dk, da_g * d_out_p), lambda b: (0, 0),
                                  pipeline_mode=pl.Buffered(1))
        else:
            w_spec = pl.BlockSpec((dk, da_g * d_out_p), lambda b: (0, 0))
        need = (2 * (x_bytes + o_bytes)
                + (1 if single_buffer_w else 2) * w_bytes
                + (4 << 20))                               # headroom
        vmem_limit = int(min(max(need, 16 << 20), 100 << 20))
        return pl.pallas_call(
            kernel,
            out_shape=jax.ShapeDtypeStruct((batch_p, d_out_p), dtype),
            grid_spec=pltpu.PrefetchScalarGridSpec(
                num_scalar_prefetch=0,
                grid=(batch_p // tb,),
                in_specs=[
                    pl.BlockSpec((tb, dk), lambda b: (b, 0)),        # x_aug tile
                    w_spec,                                          # packed weights
                ],
                out_specs=pl.BlockSpec((tb, d_out_p), lambda b: (b, 0)),  # lane-dense
            ),
            compiler_params=pltpu.CompilerParams(
                dimension_semantics=("parallel",),
                vmem_limit_bytes=vmem_limit),
            cost_estimate=cost,
        )

    try:
        out_p = make_call(True)(x_aug, w_r)
    except Exception:
        # Fallback if this jax build rejects pipeline_mode=pl.Buffered(1) on an input.
        out_p = make_call(False)(x_aug, w_r)

    return out_p[:batch, :d_out]


def _reference(x0, w1, w2, c0):
    out = x0 @ w1.T
    out = out + jnp.einsum("bi,bj,ijo->bo", x0, x0, w2)
    out = out + c0[None, :]
    return out


if __name__ == "__main__":
    # Small, module-consistent shapes: x0 (batch, x0_size) -> out (batch, x1_size)
    batch, x0_size, x1_size = 16, 16, 32

    key = jax.random.PRNGKey(0)
    kx, k1, k2, k0 = jax.random.split(key, 4)

    x0 = jax.random.normal(kx, (batch, x0_size), dtype=jnp.float32)
    # Deterministic synthetic "descriptor" coefficients (math_dtype = float32).
    w1 = jax.random.normal(k1, (x1_size, x0_size), dtype=jnp.float32) / jnp.sqrt(x0_size)
    w2 = jax.random.normal(k2, (x0_size, x0_size, x1_size), dtype=jnp.float32) / x0_size
    c0 = jax.random.normal(k0, (x1_size,), dtype=jnp.float32)

    out = symmetric_tensor_product(x0, w1, w2, c0)
    out = jax.block_until_ready(out)

    ref = _reference(x0, w1, w2, c0)
    assert out.shape == (batch, x1_size)
    assert jnp.allclose(out, ref, atol=1e-4, rtol=1e-4), "Pallas kernel mismatch vs reference"

    print("KERNEL_OK")
</pallas_src>

<mosaic_0001>
module attributes {stable_mosaic.version = 11 : i64} {
  func.func @kernel(%arg0: i32, %arg1: memref<8x24xf32, #tpu.memory_space<vmem>>, %arg2: memref<24x2304xf32, #tpu.memory_space<vmem>>, %arg3: memref<8x128xf32, #tpu.memory_space<vmem>>) attributes {dimension_semantics = [#tpu.dimension_semantics<parallel>], iteration_bounds = array<i64: 2>, scalar_prefetch = 0 : i64, scratch_operands = 0 : i64, tpu.core_type = #tpu.core_type<tc>, window_params = [{transform_indices = @transform_0, window_bounds = array<i64: 8, 24>}, {pipeline_mode = #tpu.pipeline_mode<synchronous>, transform_indices = @transform_1, window_bounds = array<i64: 24, 2304>}, {transform_indices = @transform_2, window_bounds = array<i64: 8, 128>}]} {
    %c0 = arith.constant 0 : index
    %c0_0 = arith.constant 0 : index
    %0 = vector.load %arg1[%c0, %c0_0] : memref<8x24xf32, #tpu.memory_space<vmem>>, vector<8x24xf32>
    %cst = arith.constant 0.000000e+00 : f32
    %1 = vector.broadcast %cst : f32 to vector<8x128xf32>
    %c0_1 = arith.constant 0 : index
    %c0_2 = arith.constant 0 : index
    %2 = vector.load %arg2[%c0_1, %c0_2] : memref<24x2304xf32, #tpu.memory_space<vmem>>, vector<24x256xf32>
    %cst_3 = arith.constant dense<0.000000e+00> : vector<8x256xf32>
    %3 = tpu.matmul %0, %2, %cst_3 {dimension_numbers = #tpu.dot_dimension_numbers<[1], [0], [0], [1], [0, 0, 1, 1], [], []>} : vector<8x24xf32>, vector<24x256xf32>, vector<8x256xf32> -> vector<8x256xf32>
    %4 = vector.extract_strided_slice %0 {offsets = [0, 0], sizes = [8, 1], strides = [1, 1]} : vector<8x24xf32> to vector<8x1xf32>
    %5 = vector.extract_strided_slice %3 {offsets = [0, 0], sizes = [8, 128], strides = [1, 1]} : vector<8x256xf32> to vector<8x128xf32>
    %6 = vector.broadcast %4 : vector<8x1xf32> to vector<8x128xf32>
    %7 = arith.mulf %6, %5 : vector<8x128xf32>
    %8 = arith.addf %1, %7 : vector<8x128xf32>
    %9 = vector.extract_strided_slice %0 {offsets = [0, 1], sizes = [8, 1], strides = [1, 1]} : vector<8x24xf32> to vector<8x1xf32>
    %10 = vector.extract_strided_slice %3 {offsets = [0, 128], sizes = [8, 128], strides = [1, 1]} : vector<8x256xf32> to vector<8x128xf32>
    %11 = vector.broadcast %9 : vector<8x1xf32> to vector<8x128xf32>
    %12 = arith.mulf %11, %10 : vector<8x128xf32>
    %13 = arith.addf %8, %12 : vector<8x128xf32>
    %c0_4 = arith.constant 0 : index
    %c256 = arith.constant 256 : index
    %14 = vector.load %arg2[%c0_4, %c256] : memref<24x2304xf32, #tpu.memory_space<vmem>>, vector<24x256xf32>
    %cst_5 = arith.constant dense<0.000000e+00> : vector<8x256xf32>
    %15 = tpu.matmul %0, %14, %cst_5 {dimension_numbers = #tpu.dot_dimension_numbers<[1], [0], [0], [1], [0, 0, 1, 1], [], []>} : vector<8x24xf32>, vector<24x256xf32>, vector<8x256xf32> -> vector<8x256xf32>
    %16 = vector.extract_strided_slice %0 {offsets = [0, 2], sizes = [8, 1], strides = [1, 1]} : vector<8x24xf32> to vector<8x1xf32>
    %17 = vector.extract_strided_slice %15 {offsets = [0, 0], sizes = [8, 128], strides = [1, 1]} : vector<8x256xf32> to vector<8x128xf32>
    %18 = vector.broadcast %16 : vector<8x1xf32> to vector<8x128xf32>
    %19 = arith.mulf %18, %17 : vector<8x128xf32>
    %20 = arith.addf %13, %19 : vector<8x128xf32>
    %21 = vector.extract_strided_slice %0 {offsets = [0, 3], sizes = [8, 1], strides = [1, 1]} : vector<8x24xf32> to vector<8x1xf32>
    %22 = vector.extract_strided_slice %15 {offsets = [0, 128], sizes = [8, 128], strides = [1, 1]} : vector<8x256xf32> to vector<8x128xf32>
    %23 = vector.broadcast %21 : vector<8x1xf32> to vector<8x128xf32>
    %24 = arith.mulf %23, %22 : vector<8x128xf32>
    %25 = arith.addf %20, %24 : vector<8x128xf32>
    %c0_6 = arith.constant 0 : index
    %c512 = arith.constant 512 : index
    %26 = vector.load %arg2[%c0_6, %c512] : memref<24x2304xf32, #tpu.memory_space<vmem>>, vector<24x256xf32>
    %cst_7 = arith.constant dense<0.000000e+00> : vector<8x256xf32>
    %27 = tpu.matmul %0, %26, %cst_7 {dimension_numbers = #tpu.dot_dimension_numbers<[1], [0], [0], [1], [0, 0, 1, 1], [], []>} : vector<8x24xf32>, vector<24x256xf32>, vector<8x256xf32> -> vector<8x256xf32>
    %28 = vector.extract_strided_slice %0 {offsets = [0, 4], sizes = [8, 1], strides = [1, 1]} : vector<8x24xf32> to vector<8x1xf32>
    %29 = vector.extract_strided_slice %27 {offsets = [0, 0], sizes = [8, 128], strides = [1, 1]} : vector<8x256xf32> to vector<8x128xf32>
    %30 = vector.broadcast %28 : vector<8x1xf32> to vector<8x128xf32>
    %31 = arith.mulf %30, %29 : vector<8x128xf32>
    %32 = arith.addf %25, %31 : vector<8x128xf32>
    %33 = vector.extract_strided_slice %0 {offsets = [0, 5], sizes = [8, 1], strides = [1, 1]} : vector<8x24xf32> to vector<8x1xf32>
    %34 = vector.extract_strided_slice %27 {offsets = [0, 128], sizes = [8, 128], strides = [1, 1]} : vector<8x256xf32> to vector<8x128xf32>
    %35 = vector.broadcast %33 : vector<8x1xf32> to vector<8x128xf32>
    %36 = arith.mulf %35, %34 : vector<8x128xf32>
    %37 = arith.addf %32, %36 : vector<8x128xf32>
    %c0_8 = arith.constant 0 : index
    %c768 = arith.constant 768 : index
    %38 = vector.load %arg2[%c0_8, %c768] : memref<24x2304xf32, #tpu.memory_space<vmem>>, vector<24x256xf32>
    %cst_9 = arith.constant dense<0.000000e+00> : vector<8x256xf32>
    %39 = tpu.matmul %0, %38, %cst_9 {dimension_numbers = #tpu.dot_dimension_numbers<[1], [0], [0], [1], [0, 0, 1, 1], [], []>} : vector<8x24xf32>, vector<24x256xf32>, vector<8x256xf32> -> vector<8x256xf32>
    %40 = vector.extract_strided_slice %0 {offsets = [0, 6], sizes = [8, 1], strides = [1, 1]} : vector<8x24xf32> to vector<8x1xf32>
    %41 = vector.extract_strided_slice %39 {offsets = [0, 0], sizes = [8, 128], strides = [1, 1]} : vector<8x256xf32> to vector<8x128xf32>
    %42 = vector.broadcast %40 : vector<8x1xf32> to vector<8x128xf32>
    %43 = arith.mulf %42, %41 : vector<8x128xf32>
    %44 = arith.addf %37, %43 : vector<8x128xf32>
    %45 = vector.extract_strided_slice %0 {offsets = [0, 7], sizes = [8, 1], strides = [1, 1]} : vector<8x24xf32> to vector<8x1xf32>
    %46 = vector.extract_strided_slice %39 {offsets = [0, 128], sizes = [8, 128], strides = [1, 1]} : vector<8x256xf32> to vector<8x128xf32>
    %47 = vector.broadcast %45 : vector<8x1xf32> to vector<8x128xf32>
    %48 = arith.mulf %47, %46 : vector<8x128xf32>
    %49 = arith.addf %44, %48 : vector<8x128xf32>
    %c0_10 = arith.constant 0 : index
    %c1024 = arith.constant 1024 : index
    %50 = vector.load %arg2[%c0_10, %c1024] : memref<24x2304xf32, #tpu.memory_space<vmem>>, vector<24x256xf32>
    %cst_11 = arith.constant dense<0.000000e+00> : vector<8x256xf32>
    %51 = tpu.matmul %0, %50, %cst_11 {dimension_numbers = #tpu.dot_dimension_numbers<[1], [0], [0], [1], [0, 0, 1, 1], [], []>} : vector<8x24xf32>, vector<24x256xf32>, vector<8x256xf32> -> vector<8x256xf32>
    %52 = vector.extract_strided_slice %0 {offsets = [0, 8], sizes = [8, 1], strides = [1, 1]} : vector<8x24xf32> to vector<8x1xf32>
    %53 = vector.extract_strided_slice %51 {offsets = [0, 0], sizes = [8, 128], strides = [1, 1]} : vector<8x256xf32> to vector<8x128xf32>
    %54 = vector.broadcast %52 : vector<8x1xf32> to vector<8x128xf32>
    %55 = arith.mulf %54, %53 : vector<8x128xf32>
    %56 = arith.addf %49, %55 : vector<8x128xf32>
    %57 = vector.extract_strided_slice %0 {offsets = [0, 9], sizes = [8, 1], strides = [1, 1]} : vector<8x24xf32> to vector<8x1xf32>
    %58 = vector.extract_strided_slice %51 {offsets = [0, 128], sizes = [8, 128], strides = [1, 1]} : vector<8x256xf32> to vector<8x128xf32>
    %59 = vector.broadcast %57 : vector<8x1xf32> to vector<8x128xf32>
    %60 = arith.mulf %59, %58 : vector<8x128xf32>
    %61 = arith.addf %56, %60 : vector<8x128xf32>
    %c0_12 = arith.constant 0 : index
    %c1280 = arith.constant 1280 : index
    %62 = vector.load %arg2[%c0_12, %c1280] : memref<24x2304xf32, #tpu.memory_space<vmem>>, vector<24x256xf32>
    %cst_13 = arith.constant dense<0.000000e+00> : vector<8x256xf32>
    %63 = tpu.matmul %0, %62, %cst_13 {dimension_numbers = #tpu.dot_dimension_numbers<[1], [0], [0], [1], [0, 0, 1, 1], [], []>} : vector<8x24xf32>, vector<24x256xf32>, vector<8x256xf32> -> vector<8x256xf32>
    %64 = vector.extract_strided_slice %0 {offsets = [0, 10], sizes = [8, 1], strides = [1, 1]} : vector<8x24xf32> to vector<8x1xf32>
    %65 = vector.extract_strided_slice %63 {offsets = [0, 0], sizes = [8, 128], strides = [1, 1]} : vector<8x256xf32> to vector<8x128xf32>
    %66 = vector.broadcast %64 : vector<8x1xf32> to vector<8x128xf32>
    %67 = arith.mulf %66, %65 : vector<8x128xf32>
    %68 = arith.addf %61, %67 : vector<8x128xf32>
    %69 = vector.extract_strided_slice %0 {offsets = [0, 11], sizes = [8, 1], strides = [1, 1]} : vector<8x24xf32> to vector<8x1xf32>
    %70 = vector.extract_strided_slice %63 {offsets = [0, 128], sizes = [8, 128], strides = [1, 1]} : vector<8x256xf32> to vector<8x128xf32>
    %71 = vector.broadcast %69 : vector<8x1xf32> to vector<8x128xf32>
    %72 = arith.mulf %71, %70 : vector<8x128xf32>
    %73 = arith.addf %68, %72 : vector<8x128xf32>
    %c0_14 = arith.constant 0 : index
    %c1536 = arith.constant 1536 : index
    %74 = vector.load %arg2[%c0_14, %c1536] : memref<24x2304xf32, #tpu.memory_space<vmem>>, vector<24x256xf32>
    %cst_15 = arith.constant dense<0.000000e+00> : vector<8x256xf32>
    %75 = tpu.matmul %0, %74, %cst_15 {dimension_numbers = #tpu.dot_dimension_numbers<[1], [0], [0], [1], [0, 0, 1, 1], [], []>} : vector<8x24xf32>, vector<24x256xf32>, vector<8x256xf32> -> vector<8x256xf32>
    %76 = vector.extract_strided_slice %0 {offsets = [0, 12], sizes = [8, 1], strides = [1, 1]} : vector<8x24xf32> to vector<8x1xf32>
    %77 = vector.extract_strided_slice %75 {offsets = [0, 0], sizes = [8, 128], strides = [1, 1]} : vector<8x256xf32> to vector<8x128xf32>
    %78 = vector.broadcast %76 : vector<8x1xf32> to vector<8x128xf32>
    %79 = arith.mulf %78, %77 : vector<8x128xf32>
    %80 = arith.addf %73, %79 : vector<8x128xf32>
    %81 = vector.extract_strided_slice %0 {offsets = [0, 13], sizes = [8, 1], strides = [1, 1]} : vector<8x24xf32> to vector<8x1xf32>
    %82 = vector.extract_strided_slice %75 {offsets = [0, 128], sizes = [8, 128], strides = [1, 1]} : vector<8x256xf32> to vector<8x128xf32>
    %83 = vector.broadcast %81 : vector<8x1xf32> to vector<8x128xf32>
    %84 = arith.mulf %83, %82 : vector<8x128xf32>
    %85 = arith.addf %80, %84 : vector<8x128xf32>
    %c0_16 = arith.constant 0 : index
    %c1792 = arith.constant 1792 : index
    %86 = vector.load %arg2[%c0_16, %c1792] : memref<24x2304xf32, #tpu.memory_space<vmem>>, vector<24x256xf32>
    %cst_17 = arith.constant dense<0.000000e+00> : vector<8x256xf32>
    %87 = tpu.matmul %0, %86, %cst_17 {dimension_numbers = #tpu.dot_dimension_numbers<[1], [0], [0], [1], [0, 0, 1, 1], [], []>} : vector<8x24xf32>, vector<24x256xf32>, vector<8x256xf32> -> vector<8x256xf32>
    %88 = vector.extract_strided_slice %0 {offsets = [0, 14], sizes = [8, 1], strides = [1, 1]} : vector<8x24xf32> to vector<8x1xf32>
    %89 = vector.extract_strided_slice %87 {offsets = [0, 0], sizes = [8, 128], strides = [1, 1]} : vector<8x256xf32> to vector<8x128xf32>
    %90 = vector.broadcast %88 : vector<8x1xf32> to vector<8x128xf32>
    %91 = arith.mulf %90, %89 : vector<8x128xf32>
    %92 = arith.addf %85, %91 : vector<8x128xf32>
    %93 = vector.extract_strided_slice %0 {offsets = [0, 15], sizes = [8, 1], strides = [1, 1]} : vector<8x24xf32> to vector<8x1xf32>
    %94 = vector.extract_strided_slice %87 {offsets = [0, 128], sizes = [8, 128], strides = [1, 1]} : vector<8x256xf32> to vector<8x128xf32>
    %95 = vector.broadcast %93 : vector<8x1xf32> to vector<8x128xf32>
    %96 = arith.mulf %95, %94 : vector<8x128xf32>
    %97 = arith.addf %92, %96 : vector<8x128xf32>
    %c0_18 = arith.constant 0 : index
    %c2048 = arith.constant 2048 : index
    %98 = vector.load %arg2[%c0_18, %c2048] : memref<24x2304xf32, #tpu.memory_space<vmem>>, vector<24x256xf32>
    %cst_19 = arith.constant dense<0.000000e+00> : vector<8x256xf32>
    %99 = tpu.matmul %0, %98, %cst_19 {dimension_numbers = #tpu.dot_dimension_numbers<[1], [0], [0], [1], [0, 0, 1, 1], [], []>} : vector<8x24xf32>, vector<24x256xf32>, vector<8x256xf32> -> vector<8x256xf32>
    %100 = vector.extract_strided_slice %0 {offsets = [0, 16], sizes = [8, 1], strides = [1, 1]} : vector<8x24xf32> to vector<8x1xf32>
    %101 = vector.extract_strided_slice %99 {offsets = [0, 0], sizes = [8, 128], strides = [1, 1]} : vector<8x256xf32> to vector<8x128xf32>
    %102 = vector.broadcast %100 : vector<8x1xf32> to vector<8x128xf32>
    %103 = arith.mulf %102, %101 : vector<8x128xf32>
    %104 = arith.addf %97, %103 : vector<8x128xf32>
    %105 = vector.extract_strided_slice %0 {offsets = [0, 17], sizes = [8, 1], strides = [1, 1]} : vector<8x24xf32> to vector<8x1xf32>
    %106 = vector.extract_strided_slice %99 {offsets = [0, 128], sizes = [8, 128], strides = [1, 1]} : vector<8x256xf32> to vector<8x128xf32>
    %107 = vector.broadcast %105 : vector<8x1xf32> to vector<8x128xf32>
    %108 = arith.mulf %107, %106 : vector<8x128xf32>
    %109 = arith.addf %104, %108 : vector<8x128xf32>
    %c0_20 = arith.constant 0 : index
    %c0_21 = arith.constant 0 : index
    %110 = vector.load %arg3[%c0_20, %c0_21] : memref<8x128xf32, #tpu.memory_space<vmem>>, vector<8x128xf32>
    tpu.vector_store %arg3[%c0_20, %c0_21], %109 {strides = array<i32>} : memref<8x128xf32, #tpu.memory_space<vmem>>, vector<8x128xf32>,
    return
  }
  func.func @transform_0(%arg0: i32) -> (i32, i32) {
    %c0_i32 = arith.constant 0 : i32
    %c0_i32_0 = arith.constant 0 : i32
    return %arg0, %c0_i32 : i32, i32
  }
  func.func @transform_1(%arg0: i32) -> (i32, i32) {
    %c0_i32 = arith.constant 0 : i32
    %c0_i32_0 = arith.constant 0 : i32
    %c0_i32_1 = arith.constant 0 : i32
    return %c0_i32, %c0_i32_0 : i32, i32
  }
  func.func @transform_2(%arg0: i32) -> (i32, i32) {
    %c0_i32 = arith.constant 0 : i32
    %c0_i32_0 = arith.constant 0 : i32
    return %arg0, %c0_i32 : i32, i32
  }
}

module attributes {stable_mosaic.version = 11 : i64} {
  func.func @kernel(%arg0: i32, %arg1: memref<8x24xf32, #tpu.memory_space<vmem>>, %arg2: memref<24x2304xf32, #tpu.memory_space<vmem>>, %arg3: memref<8x128xf32, #tpu.memory_space<vmem>>) attributes {dimension_semantics = [#tpu.dimension_semantics<parallel>], iteration_bounds = array<i64: 2>, scalar_prefetch = 0 : i64, scratch_operands = 0 : i64, tpu.core_type = #tpu.core_type<tc>, window_params = [{transform_indices = @transform_0, window_bounds = array<i64: 8, 24>}, {pipeline_mode = #tpu.pipeline_mode<synchronous>, transform_indices = @transform_1, window_bounds = array<i64: 24, 2304>}, {transform_indices = @transform_2, window_bounds = array<i64: 8, 128>}]} {
    %c0 = arith.constant 0 : index
    %c0_0 = arith.constant 0 : index
    %0 = vector.load %arg1[%c0, %c0_0] : memref<8x24xf32, #tpu.memory_space<vmem>>, vector<8x24xf32>
    %cst = arith.constant 0.000000e+00 : f32
    %1 = vector.broadcast %cst : f32 to vector<8x128xf32>
    %c0_1 = arith.constant 0 : index
    %c0_2 = arith.constant 0 : index
    %2 = vector.load %arg2[%c0_1, %c0_2] : memref<24x2304xf32, #tpu.memory_space<vmem>>, vector<24x256xf32>
    %cst_3 = arith.constant dense<0.000000e+00> : vector<8x256xf32>
    %3 = tpu.matmul %0, %2, %cst_3 {dimension_numbers = #tpu.dot_dimension_numbers<[1], [0], [0], [1], [0, 0, 1, 1], [], []>} : vector<8x24xf32>, vector<24x256xf32>, vector<8x256xf32> -> vector<8x256xf32>
    %4 = vector.extract_strided_slice %0 {offsets = [0, 0], sizes = [8, 1], strides = [1, 1]} : vector<8x24xf32> to vector<8x1xf32>
    %5 = vector.extract_strided_slice %3 {offsets = [0, 0], sizes = [8, 128], strides = [1, 1]} : vector<8x256xf32> to vector<8x128xf32>
    %6 = vector.broadcast %4 : vector<8x1xf32> to vector<8x128xf32>
    %7 = arith.mulf %6, %5 : vector<8x128xf32>
    %8 = arith.addf %1, %7 : vector<8x128xf32>
    %9 = vector.extract_strided_slice %0 {offsets = [0, 1], sizes = [8, 1], strides = [1, 1]} : vector<8x24xf32> to vector<8x1xf32>
    %10 = vector.extract_strided_slice %3 {offsets = [0, 128], sizes = [8, 128], strides = [1, 1]} : vector<8x256xf32> to vector<8x128xf32>
    %11 = vector.broadcast %9 : vector<8x1xf32> to vector<8x128xf32>
    %12 = arith.mulf %11, %10 : vector<8x128xf32>
    %13 = arith.addf %8, %12 : vector<8x128xf32>
    %c0_4 = arith.constant 0 : index
    %c256 = arith.constant 256 : index
    %14 = vector.load %arg2[%c0_4, %c256] : memref<24x2304xf32, #tpu.memory_space<vmem>>, vector<24x256xf32>
    %cst_5 = arith.constant dense<0.000000e+00> : vector<8x256xf32>
    %15 = tpu.matmul %0, %14, %cst_5 {dimension_numbers = #tpu.dot_dimension_numbers<[1], [0], [0], [1], [0, 0, 1, 1], [], []>} : vector<8x24xf32>, vector<24x256xf32>, vector<8x256xf32> -> vector<8x256xf32>
    %16 = vector.extract_strided_slice %0 {offsets = [0, 2], sizes = [8, 1], strides = [1, 1]} : vector<8x24xf32> to vector<8x1xf32>
    %17 = vector.extract_strided_slice %15 {offsets = [0, 0], sizes = [8, 128], strides = [1, 1]} : vector<8x256xf32> to vector<8x128xf32>
    %18 = vector.broadcast %16 : vector<8x1xf32> to vector<8x128xf32>
    %19 = arith.mulf %18, %17 : vector<8x128xf32>
    %20 = arith.addf %13, %19 : vector<8x128xf32>
    %21 = vector.extract_strided_slice %0 {offsets = [0, 3], sizes = [8, 1], strides = [1, 1]} : vector<8x24xf32> to vector<8x1xf32>
    %22 = vector.extract_strided_slice %15 {offsets = [0, 128], sizes = [8, 128], strides = [1, 1]} : vector<8x256xf32> to vector<8x128xf32>
    %23 = vector.broadcast %21 : vector<8x1xf32> to vector<8x128xf32>
    %24 = arith.mulf %23, %22 : vector<8x128xf32>
    %25 = arith.addf %20, %24 : vector<8x128xf32>
    %c0_6 = arith.constant 0 : index
    %c512 = arith.constant 512 : index
    %26 = vector.load %arg2[%c0_6, %c512] : memref<24x2304xf32, #tpu.memory_space<vmem>>, vector<24x256xf32>
    %cst_7 = arith.constant dense<0.000000e+00> : vector<8x256xf32>
    %27 = tpu.matmul %0, %26, %cst_7 {dimension_numbers = #tpu.dot_dimension_numbers<[1], [0], [0], [1], [0, 0, 1, 1], [], []>} : vector<8x24xf32>, vector<24x256xf32>, vector<8x256xf32> -> vector<8x256xf32>
    %28 = vector.extract_strided_slice %0 {offsets = [0, 4], sizes = [8, 1], strides = [1, 1]} : vector<8x24xf32> to vector<8x1xf32>
    %29 = vector.extract_strided_slice %27 {offsets = [0, 0], sizes = [8, 128], strides = [1, 1]} : vector<8x256xf32> to vector<8x128xf32>
    %30 = vector.broadcast %28 : vector<8x1xf32> to vector<8x128xf32>
    %31 = arith.mulf %30, %29 : vector<8x128xf32>
    %32 = arith.addf %25, %31 : vector<8x128xf32>
    %33 = vector.extract_strided_slice %0 {offsets = [0, 5], sizes = [8, 1], strides = [1, 1]} : vector<8x24xf32> to vector<8x1xf32>
    %34 = vector.extract_strided_slice %27 {offsets = [0, 128], sizes = [8, 128], strides = [1, 1]} : vector<8x256xf32> to vector<8x128xf32>
    %35 = vector.broadcast %33 : vector<8x1xf32> to vector<8x128xf32>
    %36 = arith.mulf %35, %34 : vector<8x128xf32>
    %37 = arith.addf %32, %36 : vector<8x128xf32>
    %c0_8 = arith.constant 0 : index
    %c768 = arith.constant 768 : index
    %38 = vector.load %arg2[%c0_8, %c768] : memref<24x2304xf32, #tpu.memory_space<vmem>>, vector<24x256xf32>
    %cst_9 = arith.constant dense<0.000000e+00> : vector<8x256xf32>
    %39 = tpu.matmul %0, %38, %cst_9 {dimension_numbers = #tpu.dot_dimension_numbers<[1], [0], [0], [1], [0, 0, 1, 1], [], []>} : vector<8x24xf32>, vector<24x256xf32>, vector<8x256xf32> -> vector<8x256xf32>
    %40 = vector.extract_strided_slice %0 {offsets = [0, 6], sizes = [8, 1], strides = [1, 1]} : vector<8x24xf32> to vector<8x1xf32>
    %41 = vector.extract_strided_slice %39 {offsets = [0, 0], sizes = [8, 128], strides = [1, 1]} : vector<8x256xf32> to vector<8x128xf32>
    %42 = vector.broadcast %40 : vector<8x1xf32> to vector<8x128xf32>
    %43 = arith.mulf %42, %41 : vector<8x128xf32>
    %44 = arith.addf %37, %43 : vector<8x128xf32>
    %45 = vector.extract_strided_slice %0 {offsets = [0, 7], sizes = [8, 1], strides = [1, 1]} : vector<8x24xf32> to vector<8x1xf32>
    %46 = vector.extract_strided_slice %39 {offsets = [0, 128], sizes = [8, 128], strides = [1, 1]} : vector<8x256xf32> to vector<8x128xf32>
    %47 = vector.broadcast %45 : vector<8x1xf32> to vector<8x128xf32>
    %48 = arith.mulf %47, %46 : vector<8x128xf32>
    %49 = arith.addf %44, %48 : vector<8x128xf32>
    %c0_10 = arith.constant 0 : index
    %c1024 = arith.constant 1024 : index
    %50 = vector.load %arg2[%c0_10, %c1024] : memref<24x2304xf32, #tpu.memory_space<vmem>>, vector<24x256xf32>
    %cst_11 = arith.constant dense<0.000000e+00> : vector<8x256xf32>
    %51 = tpu.matmul %0, %50, %cst_11 {dimension_numbers = #tpu.dot_dimension_numbers<[1], [0], [0], [1], [0, 0, 1, 1], [], []>} : vector<8x24xf32>, vector<24x256xf32>, vector<8x256xf32> -> vector<8x256xf32>
    %52 = vector.extract_strided_slice %0 {offsets = [0, 8], sizes = [8, 1], strides = [1, 1]} : vector<8x24xf32> to vector<8x1xf32>
    %53 = vector.extract_strided_slice %51 {offsets = [0, 0], sizes = [8, 128], strides = [1, 1]} : vector<8x256xf32> to vector<8x128xf32>
    %54 = vector.broadcast %52 : vector<8x1xf32> to vector<8x128xf32>
    %55 = arith.mulf %54, %53 : vector<8x128xf32>
    %56 = arith.addf %49, %55 : vector<8x128xf32>
    %57 = vector.extract_strided_slice %0 {offsets = [0, 9], sizes = [8, 1], strides = [1, 1]} : vector<8x24xf32> to vector<8x1xf32>
    %58 = vector.extract_strided_slice %51 {offsets = [0, 128], sizes = [8, 128], strides = [1, 1]} : vector<8x256xf32> to vector<8x128xf32>
    %59 = vector.broadcast %57 : vector<8x1xf32> to vector<8x128xf32>
    %60 = arith.mulf %59, %58 : vector<8x128xf32>
    %61 = arith.addf %56, %60 : vector<8x128xf32>
    %c0_12 = arith.constant 0 : index
    %c1280 = arith.constant 1280 : index
    %62 = vector.load %arg2[%c0_12, %c1280] : memref<24x2304xf32, #tpu.memory_space<vmem>>, vector<24x256xf32>
    %cst_13 = arith.constant dense<0.000000e+00> : vector<8x256xf32>
    %63 = tpu.matmul %0, %62, %cst_13 {dimension_numbers = #tpu.dot_dimension_numbers<[1], [0], [0], [1], [0, 0, 1, 1], [], []>} : vector<8x24xf32>, vector<24x256xf32>, vector<8x256xf32> -> vector<8x256xf32>
    %64 = vector.extract_strided_slice %0 {offsets = [0, 10], sizes = [8, 1], strides = [1, 1]} : vector<8x24xf32> to vector<8x1xf32>
    %65 = vector.extract_strided_slice %63 {offsets = [0, 0], sizes = [8, 128], strides = [1, 1]} : vector<8x256xf32> to vector<8x128xf32>
    %66 = vector.broadcast %64 : vector<8x1xf32> to vector<8x128xf32>
    %67 = arith.mulf %66, %65 : vector<8x128xf32>
    %68 = arith.addf %61, %67 : vector<8x128xf32>
    %69 = vector.extract_strided_slice %0 {offsets = [0, 11], sizes = [8, 1], strides = [1, 1]} : vector<8x24xf32> to vector<8x1xf32>
    %70 = vector.extract_strided_slice %63 {offsets = [0, 128], sizes = [8, 128], strides = [1, 1]} : vector<8x256xf32> to vector<8x128xf32>
    %71 = vector.broadcast %69 : vector<8x1xf32> to vector<8x128xf32>
    %72 = arith.mulf %71, %70 : vector<8x128xf32>
    %73 = arith.addf %68, %72 : vector<8x128xf32>
    %c0_14 = arith.constant 0 : index
    %c1536 = arith.constant 1536 : index
    %74 = vector.load %arg2[%c0_14, %c1536] : memref<24x2304xf32, #tpu.memory_space<vmem>>, vector<24x256xf32>
    %cst_15 = arith.constant dense<0.000000e+00> : vector<8x256xf32>
    %75 = tpu.matmul %0, %74, %cst_15 {dimension_numbers = #tpu.dot_dimension_numbers<[1], [0], [0], [1], [0, 0, 1, 1], [], []>} : vector<8x24xf32>, vector<24x256xf32>, vector<8x256xf32> -> vector<8x256xf32>
    %76 = vector.extract_strided_slice %0 {offsets = [0, 12], sizes = [8, 1], strides = [1, 1]} : vector<8x24xf32> to vector<8x1xf32>
    %77 = vector.extract_strided_slice %75 {offsets = [0, 0], sizes = [8, 128], strides = [1, 1]} : vector<8x256xf32> to vector<8x128xf32>
    %78 = vector.broadcast %76 : vector<8x1xf32> to vector<8x128xf32>
    %79 = arith.mulf %78, %77 : vector<8x128xf32>
    %80 = arith.addf %73, %79 : vector<8x128xf32>
    %81 = vector.extract_strided_slice %0 {offsets = [0, 13], sizes = [8, 1], strides = [1, 1]} : vector<8x24xf32> to vector<8x1xf32>
    %82 = vector.extract_strided_slice %75 {offsets = [0, 128], sizes = [8, 128], strides = [1, 1]} : vector<8x256xf32> to vector<8x128xf32>
    %83 = vector.broadcast %81 : vector<8x1xf32> to vector<8x128xf32>
    %84 = arith.mulf %83, %82 : vector<8x128xf32>
    %85 = arith.addf %80, %84 : vector<8x128xf32>
    %c0_16 = arith.constant 0 : index
    %c1792 = arith.constant 1792 : index
    %86 = vector.load %arg2[%c0_16, %c1792] : memref<24x2304xf32, #tpu.memory_space<vmem>>, vector<24x256xf32>
    %cst_17 = arith.constant dense<0.000000e+00> : vector<8x256xf32>
    %87 = tpu.matmul %0, %86, %cst_17 {dimension_numbers = #tpu.dot_dimension_numbers<[1], [0], [0], [1], [0, 0, 1, 1], [], []>} : vector<8x24xf32>, vector<24x256xf32>, vector<8x256xf32> -> vector<8x256xf32>
    %88 = vector.extract_strided_slice %0 {offsets = [0, 14], sizes = [8, 1], strides = [1, 1]} : vector<8x24xf32> to vector<8x1xf32>
    %89 = vector.extract_strided_slice %87 {offsets = [0, 0], sizes = [8, 128], strides = [1, 1]} : vector<8x256xf32> to vector<8x128xf32>
    %90 = vector.broadcast %88 : vector<8x1xf32> to vector<8x128xf32>
    %91 = arith.mulf %90, %89 : vector<8x128xf32>
    %92 = arith.addf %85, %91 : vector<8x128xf32>
    %93 = vector.extract_strided_slice %0 {offsets = [0, 15], sizes = [8, 1], strides = [1, 1]} : vector<8x24xf32> to vector<8x1xf32>
    %94 = vector.extract_strided_slice %87 {offsets = [0, 128], sizes = [8, 128], strides = [1, 1]} : vector<8x256xf32> to vector<8x128xf32>
    %95 = vector.broadcast %93 : vector<8x1xf32> to vector<8x128xf32>
    %96 = arith.mulf %95, %94 : vector<8x128xf32>
    %97 = arith.addf %92, %96 : vector<8x128xf32>
    %c0_18 = arith.constant 0 : index
    %c2048 = arith.constant 2048 : index
    %98 = vector.load %arg2[%c0_18, %c2048] : memref<24x2304xf32, #tpu.memory_space<vmem>>, vector<24x256xf32>
    %cst_19 = arith.constant dense<0.000000e+00> : vector<8x256xf32>
    %99 = tpu.matmul %0, %98, %cst_19 {dimension_numbers = #tpu.dot_dimension_numbers<[1], [0], [0], [1], [0, 0, 1, 1], [], []>} : vector<8x24xf32>, vector<24x256xf32>, vector<8x256xf32> -> vector<8x256xf32>
    %100 = vector.extract_strided_slice %0 {offsets = [0, 16], sizes = [8, 1], strides = [1, 1]} : vector<8x24xf32> to vector<8x1xf32>
    %101 = vector.extract_strided_slice %99 {offsets = [0, 0], sizes = [8, 128], strides = [1, 1]} : vector<8x256xf32> to vector<8x128xf32>
    %102 = vector.broadcast %100 : vector<8x1xf32> to vector<8x128xf32>
    %103 = arith.mulf %102, %101 : vector<8x128xf32>
    %104 = arith.addf %97, %103 : vector<8x128xf32>
    %105 = vector.extract_strided_slice %0 {offsets = [0, 17], sizes = [8, 1], strides = [1, 1]} : vector<8x24xf32> to vector<8x1xf32>
    %106 = vector.extract_strided_slice %99 {offsets = [0, 128], sizes = [8, 128], strides = [1, 1]} : vector<8x256xf32> to vector<8x128xf32>
    %107 = vector.broadcast %105 : vector<8x1xf32> to vector<8x128xf32>
    %108 = arith.mulf %107, %106 : vector<8x128xf32>
    %109 = arith.addf %104, %108 : vector<8x128xf32>
    %c0_20 = arith.constant 0 : index
    %c0_21 = arith.constant 0 : index
    %110 = vector.load %arg3[%c0_20, %c0_21] : memref<8x128xf32, #tpu.memory_space<vmem>>, vector<8x128xf32>
    tpu.vector_store %arg3[%c0_20, %c0_21], %109 {strides = array<i32>} : memref<8x128xf32, #tpu.memory_space<vmem>>, vector<8x128xf32>,
    return
  }
  func.func @transform_0(%arg0: i32) -> (i32, i32) {
    %c0_i32 = arith.constant 0 : i32
    %c0_i32_0 = arith.constant 0 : i32
    return %arg0, %c0_i32 : i32, i32
  }
  func.func @transform_1(%arg0: i32) -> (i32, i32) {
    %c0_i32 = arith.constant 0 : i32
    %c0_i32_0 = arith.constant 0 : i32
    %c0_i32_1 = arith.constant 0 : i32
    return %c0_i32, %c0_i32_0 : i32, i32
  }
  func.func @transform_2(%arg0: i32) -> (i32, i32) {
    %c0_i32 = arith.constant 0 : i32
    %c0_i32_0 = arith.constant 0 : i32
    return %arg0, %c0_i32 : i32, i32
  }
}

</mosaic_0001>

<bundles_post_ra>
// kernel: tpu_custom_call.1
= control target key start
LH: loop header
LB: loop body
LE: loop exit
PB: predicated region body
PF: predicated region fallthrough
CT: control target
= control target key end

     0   :  { %7 = vsyncpa [#allocation3], 0  ;;  %s1294_s0 = inlined_call_operand.hbm [shape: f32[16,24], index: 0, kind: input, shape index: {}]   ;;  %s1295_s1 = inlined_call_operand.hbm [shape: f32[24,2304], index: 1, kind: input, shape index: {}]   ;;  %s1296_s2 = inlined_call_operand.hbm [shape: f32[16,128], index: 2, kind: output, shape index: {}]  }
   0x1   :  { %9 = vsyncpa [#allocation3 + $0x1], 0 }
   0x2   :  { %10 = vsyncpa [#allocation6], 0 }
   0x3   :  { %11 = vsyncpa [#allocation4], 0 }
   0x4   :  { %13 = vsyncpa [#allocation4 + $0x1], 0  ;;  %s1098_s9 = smov 0   ;;  %s1100_s10 = smov 0  }
   0x5   :  { %s1102_s11 = smov 0   ;;  %s1104_s12 = smov 0  }
   0x6 LB: > { %s108_s15 = sshll.u32 %s1295_s1, 4  ;;  %s1122_s16 = sadd.s32 4294967295, %s1060_s12   ;;  %s1060_s12 = sphi %s1104_s12, %s1306_s12   ;;  %s1056_s11 = sphi %s1102_s11, %s1305_s11   ;;  %s1052_s10 = sphi %s1100_s10, %s1304_s10   ;;  %s1048_s9 = sphi %s1098_s9, %s1303_s9   ;;  %s109_s15 = int_to_ptr.hbm [resolvable:$true] %s108_s15 }
   0x7   : > { %p803_p0 = scmp.ge.s32.totalorder %s1060_s12, 1  ;;  %p40_p1 = scmp.eq.s32.totalorder %s1122_s16, 0 }
   0x8   : > { %p97_p2 = scmp.lt.s32.totalorder %s1060_s12, 3  ;;  %s1062_s18 = smov [#allocation5]  }
   0x9   : > { %s110_s19 = sshll.u32 %s1062_s18, 4  ;;  %s1063_s20 = smov 2304   ;;  %s111_s19 = int_to_ptr.vmem [resolvable:$true] %s110_s19 }
   0xa   : > { %p1127_p3 = pnand %p803_p0, %p97_p2  ;;  %s1064_s21 = smov 144  }
   0xb   : > { %s802_s22 = sadd.s32 4294967294, %s1060_s12   ;;  %s1138_s23 = sadd.s32 1, %s1060_s12  }
   0xc   : > { %p842_p4 = pneg %p1127_p3  ;;  %s26_s24 = sadd.s32 1, %s1056_s11 }
   0xd   : > { %s23_s25 = ssub.s32 %s1060_s12, %s1138_s23  ;;  %p33_p7 = scmp.ne.s32.totalorder %s1056_s11, %s1052_s10 }
   0xe   : > { %p843_p6 = pnand %p842_p4, %p40_p1  ;;  %p24_p8 = scmp.eq.s32.totalorder %s23_s25, 0 }
   0xf   : > { %p34_p9 = scmp.eq.s32.totalorder %s1060_s12, 0  ;;  %p39_p10 = scmp.ne.s32.totalorder %s1052_s10, %s1048_s9 }
  0x10   : > { %845 = dma.hbm_to_vmem [thread:$0]  (!%p843_p6), %s109_s15, 6912, %s111_s19, [#allocation6], %s1063_s20, %s1063_s20, %s1064_s21  }
  0x11   : > { %p84_p11 = scmp.eq.s32.totalorder %s1122_s16, 1  ;;  %p1154_p12 = por %p40_p1, %p39_p10 }
  0x12   : > { %s1150_s26 = scalar_select %p24_p8, %s1056_s11, %s26_s24  }
  0x13   : > { %p1158_p13 = por %p84_p11, %p33_p7  ;;  %p90_p0 = scmp.eq.s32.totalorder %s802_s22, 1 }
  0x14   : > { %p35_p2 = por %p34_p9, %p33_p7  ;;  %s124_s29 = sand.u32 1, %s1056_s11  }
  0x15   : > { %p1163_p4 = por %p90_p0, %p39_p10  ;;  %p855_p6 = scmp.lt.s32.totalorder %s1060_s12, 2 }
  0x16   : > { %s806_s3 = sshll.u32 %s124_s29, 3  ;;  %s807_s4 = sshll.u32 %s1060_s12, 3 }
  0x17   : > { %s132_s7 = scalar_lea.hbm %s1294_s0, %s807_s4  ;;  %s128_s13 = scalar_lea.vmem [#allocation2], %s806_s3 }
  0x18   : > { %s134_s8 = sshll.u32 %s132_s7, 4  ;;  %s136_s14 = sshll.u32 %s128_s13, 4  ;;  %s135_s8 = int_to_ptr.hbm [resolvable:$true] %s134_s8  ;;  %s137_s14 = int_to_ptr.vmem [resolvable:$true] %s136_s14 }
  0x19   : > { %p1172_p8 = pnand %p855_p6, %p35_p2  ;;  %s125_s18 = scalar_lea.sflag [#allocation3], %s124_s29 }
  0x1a   : > { %s960_s19 = sshra.s32 %s135_s8, 4  ;;  %s967_s24 = scalar_lea.hbm %s1294_s0, 16  ;;  %s961_s19 = int_to_ptr.hbm [resolvable:$true] %s960_s19 }
  0x1b   : > { %s962_s20 = scalar_lea.hbm %s961_s19, 8  ;;  %p964_p9 = pneg %p1172_p8 }
  0x1c   : > { %p963_p7 = scmp.ne.s32.totalorder %s961_s19, %s962_s20  ;;  %p968_p0 = scmp.lt.s32.totalorder %s961_s19, %s1294_s0 }
  0x1d   : > { %p969_p2 = scmp.lt.s32.totalorder %s967_s24, %s962_s20 }
  0x1e   : > { %p965_p10 = pnand %p964_p9, %p963_p7 }
  0x1f   : > { %p970_p6 = por %p969_p2, %p968_p0 }
  0x20   : > { %p966_p11 = pneg %p965_p10 }
  0x22   : > { %p971_p5 = pnand %p970_p6, %p966_p11 }
  0x24   : > { %974 = shalt.err (!%p971_p5)
}
  0x25   : > { %849 = dma.hbm_to_vmem [thread:$0]  (!%p1172_p8), %s135_s8, 128, %s137_s14, %s125_s18  }
  0x26   : > { %145 = sbr.rel (%p1127_p3) target bundleno = 231 (0xe7), region = 28  ;;  %s1189_s29 = sand.u32 (!%p1127_p3), 1, %s1052_s10  }
  0x27   : > { %s809_s4 = sshll.u32 (!%p1127_p3), %s1189_s29, 3  ;;  %s148_s5 = scalar_lea.sflag (!%p1127_p3), [#allocation3], %s1189_s29 }
  0x28   : > { %s151_s6 = scalar_lea.vmem (!%p1127_p3), [#allocation2], %s809_s4 }
  0x2b   : > { %1035 = dma.done.wait (%p1154_p12), %s148_s5, 128  }
  0x2c   : > { %1037 = vsyncadd (%p1154_p12), %s148_s5, 4294967168 }
  0x2d   : > { %1039 = dma.done.wait (%p40_p1), [#allocation6], 6912  }
  0x2e   : > { %1041 = vsyncadd (%p40_p1), [#allocation6], 4294960384  ;;  %v1065_v0 = vmov 2   ;;  %v1066_v1 = vmov 0   ;;  %v1067_v2 = vmov 4   ;;  %v183_v3 = vld [vmem:[#allocation5 + $0x120] sm:$0xff] }
  0x2f   : > { %913 = vset.pattern.permute.xlu1 %v1065_v0  ;;  %911 = vset.pattern.permute.xlu0 %v1066_v1  ;;  %v184_v4 = vld [vmem:[#allocation5 + $0x128] sm:$0xff]  ;;  %v245_v5 = vld [vmem:[#allocation5 + $0x130] sm:$0xff]  ;;  %v246_v6 = vld [vmem:[#allocation5 + $0x138] sm:$0xff]  ;;  %vm185_vm0 = vcmask 195584   ;;  %v1068_v24 = vmov 3   ;;  %v1069_v33 = vmov 1  }
  0x30   : > { %915 = vset.pattern.permute.xlu2 %v1067_v2  ;;  %202 = vmatpush.msra.mxu0 %v183_v3  ;;  %v1203_v7 = vld [vmem:[%s151_s6] sm:$0xff]  ;;  %v243_v10 = vld [vmem:[#allocation5 + $0xa0] sm:$0xff]  ;;  %v244_v11 = vld [vmem:[#allocation5 + $0xa8] sm:$0xff]  ;;  %v1070_v38 = vmov 6   ;;  %v1071_v50 = vmov 9   ;;  %v1072_v56 = vmov 8  }
  0x31   : > { %222 = vmatpush.msra.mxu1 %v184_v4  ;;  %v181_v8 = vld [vmem:[#allocation5 + $0x90] sm:$0xff]  ;;  %260 = vmatpush.msra.mxu2 %v245_v5  ;;  %v182_v9 = vld [vmem:[#allocation5 + $0x98] sm:$0xff]  ;;  %v179_v12 = vld [vmem:[#allocation5] sm:$0xff]  ;;  %v1073_v57 = vmov 5   ;;  %v1074_v60 = vmov 11   ;;  %v1075_v1 = vmov 13  }
  0x32   : > { %280 = vmatpush.msra.mxu3 %v246_v6  ;;  %288 = vperm.xlu1 %913, %v1203_v7   ;;  %v180_v13 = vld [vmem:[#allocation5 + $0x8] sm:$0xff]  ;;  %v241_v14 = vld [vmem:[#allocation5 + $0x10] sm:$0xff]  ;;  %v242_v15 = vld [vmem:[#allocation5 + $0x18] sm:$0xff]  ;;  %v1076_v2 = vmov 7   ;;  %v1077_v3 = vmov 14   ;;  %v1078_v4 = vmov 17  }
  0x33   : > { %203 = vmatpush.msra.mxu0 %v181_v8  ;;  %223 = vmatpush.msra.mxu1 %v182_v9  ;;  %v303_v16 = vld [vmem:[#allocation5 + $0x140] sm:$0xff]  ;;  %v304_v17 = vld [vmem:[#allocation5 + $0x148] sm:$0xff]  ;;  %v361_v18 = vld [vmem:[#allocation5 + $0x150] sm:$0xff]  ;;  %v1079_v5 = vmov 10   ;;  %v1080_v6 = vmov 16   ;;  %v1081_v8 = vmov 12  }
  0x34   : > { %261 = vmatpush.msra.mxu2 %v243_v10  ;;  %281 = vmatpush.msra.mxu3 %v244_v11  ;;  %v362_v19 = vld [vmem:[#allocation5 + $0x158] sm:$0xff]  ;;  %v301_v20 = vld [vmem:[#allocation5 + $0xb0] sm:$0xff]  ;;  %v359_v22 = vld [vmem:[#allocation5 + $0xc0] sm:$0xff]  ;;  %v1082_v9 = vmov 15   ;;  %s831_s17 = sshll.u32 %s1122_s16, 3  ;;  %s177_s13 = scalar_lea.vmem [#allocation7], %s809_s4 }
  0x35   : > { %204 = vmatpush.msra.mxu0 %v179_v12  ;;  %224 = vmatpush.msra.mxu1 %v180_v13  ;;  %v302_v21 = vld [vmem:[#allocation5 + $0xb8] sm:$0xff]  ;;  %v360_v23 = vld [vmem:[#allocation5 + $0xc8] sm:$0xff]  ;;  %v299_v25 = vld [vmem:[#allocation5 + $0x20] sm:$0xff]  ;;  %s717_s8 = scalar_lea.hbm %s1296_s2, %s831_s17  ;;  %s719_s14 = sshll.u32 %s177_s13, 4  ;;  %s720_s14 = int_to_ptr.vmem [resolvable:$true] %s719_s14 }
  0x36   : > { %262 = vmatpush.msra.mxu2 %v241_v14  ;;  %282 = vmatpush.msra.mxu3 %v242_v15  ;;  %v300_v26 = vld [vmem:[#allocation5 + $0x28] sm:$0xff]  ;;  %v357_v27 = vld [vmem:[#allocation5 + $0x30] sm:$0xff]  ;;  %v358_v28 = vld [vmem:[#allocation5 + $0x38] sm:$0xff]  ;;  %s721_s15 = sshll.u32 %s717_s8, 4  ;;  %s707_s16 = scalar_lea.sflag [#allocation4], %s1189_s29  ;;  %s722_s15 = int_to_ptr.hbm [resolvable:$true] %s721_s15 }
  0x37   : > { %812 = vmatmul.msk.f32.vlgmr.msra.gmra.mxu0 %vm185_vm0, %v1203_v7  ;;  %813 = vmatmul.msk.f32.vlgmr.msra.gmra.mxu1 %vm185_vm0, %v1203_v7  ;;  %v419_v29 = vld [vmem:[#allocation5 + $0x160] sm:$0xff]  ;;  %v420_v30 = vld [vmem:[#allocation5 + $0x168] sm:$0xff]  ;;  %v477_v31 = vld [vmem:[#allocation5 + $0x170] sm:$0xff]  ;;  %s1004_s18 = sshra.s32 %s722_s15, 4  ;;  %s1010_s22 = scalar_lea.hbm %s1296_s2, 16  ;;  %s1005_s18 = int_to_ptr.hbm [resolvable:$true] %s1004_s18 }
  0x38   : > { %814 = vmatmul.msk.f32.vlgmr.msra.gmra.mxu2 %vm185_vm0, %v1203_v7  ;;  %815 = vmatmul.msk.f32.vlgmr.msra.gmra.mxu3 %vm185_vm0, %v1203_v7  ;;  %v478_v32 = vld [vmem:[#allocation5 + $0x178] sm:$0xff]  ;;  %v417_v34 = vld [vmem:[#allocation5 + $0xd0] sm:$0xff]  ;;  %v475_v36 = vld [vmem:[#allocation5 + $0xe0] sm:$0xff]  ;;  %s1006_s19 = scalar_lea.hbm %s1005_s18, 8  ;;  %p1011_p12 = scmp.lt.s32.totalorder %s1005_s18, %s1296_s2 }
  0x39   : > { %230 = vperm.xlu0 %911, %v1203_v7   ;;  %318 = vmatpush.msrb.mxu0 %v303_v16  ;;  %v418_v35 = vld [vmem:[#allocation5 + $0xd8] sm:$0xff]  ;;  %v476_v37 = vld [vmem:[#allocation5 + $0xe8] sm:$0xff]  ;;  %v415_v39 = vld [vmem:[#allocation5 + $0x40] sm:$0xff]  ;;  %p1007_p1 = scmp.ne.s32.totalorder %s1005_s18, %s1006_s19  ;;  %p1012_p8 = scmp.lt.s32.totalorder %s1010_s22, %s1006_s19 }
  0x3a   : > { %338 = vmatpush.msrb.mxu1 %v304_v17  ;;  %376 = vmatpush.msrb.mxu2 %v361_v18  ;;  %v416_v40 = vld [vmem:[#allocation5 + $0x48] sm:$0xff]  ;;  %v473_v41 = vld [vmem:[#allocation5 + $0x50] sm:$0xff]  ;;  %v474_v42 = vld [vmem:[#allocation5 + $0x58] sm:$0xff] }
  0x3b   : > { %396 = vmatpush.msrb.mxu3 %v362_v19  ;;  %914 = vset.pattern.permute.xlu1 %v1068_v24  ;;  %v535_v43 = vld [vmem:[#allocation5 + $0x180] sm:$0xff]  ;;  %v593_v44 = vld [vmem:[#allocation5 + $0x190] sm:$0xff]  ;;  %v594_v45 = vld [vmem:[#allocation5 + $0x198] sm:$0xff]  ;;  %p1008_p3 = pnand %p1007_p1, %p1158_p13  ;;  %p1013_p7 = por %p1012_p8, %p1011_p12 }
  0x3c   : > { %319 = vmatpush.msrb.mxu0 %v301_v20  ;;  %294 = vperm.xlu1 %914, %v1203_v7   ;;  %v533_v46 = vld [vmem:[#allocation5 + $0xf0] sm:$0xff]  ;;  %v591_v47 = vld [vmem:[#allocation5 + $0x100] sm:$0xff]  ;;  %v592_v48 = vld [vmem:[#allocation5 + $0x108] sm:$0xff] }
  0x3d   : > { %339 = vmatpush.msrb.mxu1 %v302_v21  ;;  %377 = vmatpush.msrb.mxu2 %v359_v22  ;;  %v531_v49 = vld [vmem:[#allocation5 + $0x60] sm:$0xff]  ;;  %v536_v51 = vld [vmem:[#allocation5 + $0x188] sm:$0xff]  ;;  %v589_v52 = vld [vmem:[#allocation5 + $0x70] sm:$0xff]  ;;  %p1009_p5 = pneg %p1008_p3 }
  0x3e   : > { %397 = vmatpush.msrb.mxu3 %v360_v23  ;;  %320 = vmatpush.msrb.mxu0 %v299_v25  ;;  %v590_v53 = vld [vmem:[#allocation5 + $0x78] sm:$0xff]  ;;  %v532_v55 = vld [vmem:[#allocation5 + $0x68] sm:$0xff]  ;;  %v651_v58 = vld [vmem:[#allocation5 + $0x1a0] sm:$0xff] }
  0x3f   : > { %340 = vmatpush.msrb.mxu1 %v300_v26  ;;  %378 = vmatpush.msrb.mxu2 %v357_v27  ;;  %v534_v54 = vld [vmem:[#allocation5 + $0xf8] sm:$0xff]  ;;  %v652_v59 = vld [vmem:[#allocation5 + $0x1a8] sm:$0xff]  ;;  %v649_v61 = vld [vmem:[#allocation5 + $0x110] sm:$0xff]  ;;  %p1014_p9 = pnand %p1013_p7, %p1009_p5 }
  0x40   : > { %398 = vmatpush.msrb.mxu3 %v358_v28  ;;  %816 = vmatmul.msk.f32.vlgmr.msrb.gmra.mxu0 %vm185_vm0, %v1203_v7  ;;  %v650_v62 = vld [vmem:[#allocation5 + $0x118] sm:$0xff]  ;;  %v647_v63 = vld [vmem:[#allocation5 + $0x80] sm:$0xff]  ;;  %v648_v0 = vld [vmem:[#allocation5 + $0x88] sm:$0xff] }
  0x41   : > { %817 = vmatmul.msk.f32.vlgmr.msrb.gmra.mxu1 %vm185_vm0, %v1203_v7  ;;  %818 = vmatmul.msk.f32.vlgmr.msrb.gmra.mxu2 %vm185_vm0, %v1203_v7 }
  0x42   : > { %819 = vmatmul.msk.f32.vlgmr.msrb.gmra.mxu3 %vm185_vm0, %v1203_v7  ;;  %912 = vset.pattern.permute.xlu0 %v1069_v33 }
  0x43   : > { %434 = vmatpush.msra.mxu0 %v419_v29  ;;  %236 = vperm.xlu0 %912, %v1203_v7  }
  0x44   : > { %454 = vmatpush.msra.mxu1 %v420_v30  ;;  %492 = vmatpush.msra.mxu2 %v477_v31 }
  0x45   : > { %512 = vmatpush.msra.mxu3 %v478_v32  ;;  %917 = vset.pattern.permute.xlu1 %v1070_v38 }
  0x46   : > { %435 = vmatpush.msra.mxu0 %v417_v34  ;;  %404 = vperm.xlu1 %917, %v1203_v7  }
  0x47   : > { %455 = vmatpush.msra.mxu1 %v418_v35  ;;  %493 = vmatpush.msra.mxu2 %v475_v36 }
  0x48   : > { %513 = vmatpush.msra.mxu3 %v476_v37  ;;  %436 = vmatpush.msra.mxu0 %v415_v39 }
  0x49   : > { %456 = vmatpush.msra.mxu1 %v416_v40  ;;  %494 = vmatpush.msra.mxu2 %v473_v41 }
  0x4a   : > { %514 = vmatpush.msra.mxu3 %v474_v42  ;;  %820 = vmatmul.msk.f32.vlgmr.msra.gmra.mxu0 %vm185_vm0, %v1203_v7 }
  0x4b   : > { %821 = vmatmul.msk.f32.vlgmr.msra.gmra.mxu1 %vm185_vm0, %v1203_v7  ;;  %822 = vmatmul.msk.f32.vlgmr.msra.gmra.mxu2 %vm185_vm0, %v1203_v7 }
  0x4c   : > { %823 = vmatmul.msk.f32.vlgmr.msra.gmra.mxu3 %vm185_vm0, %v1203_v7  ;;  %550 = vmatpush.msrb.mxu0 %v535_v43 }
  0x4d   : > { %608 = vmatpush.msrb.mxu2 %v593_v44  ;;  %628 = vmatpush.msrb.mxu3 %v594_v45 }
  0x4e   : > { %346 = vperm.xlu2 %915, %v1203_v7   ;;  %920 = vset.pattern.permute.xlu1 %v1071_v50 }
  0x4f   : > { %551 = vmatpush.msrb.mxu0 %v533_v46  ;;  %609 = vmatpush.msrb.mxu2 %v591_v47 }
  0x50   : > { %468 = vperm.xlu1 %920, %v1203_v7   ;;  %629 = vmatpush.msrb.mxu3 %v592_v48 }
  0x51   : > { %552 = vmatpush.msrb.mxu0 %v531_v49  ;;  %570 = vmatpush.msrb.mxu1 %v536_v51 }
  0x52   : > { %610 = vmatpush.msrb.mxu2 %v589_v52  ;;  %824 = vmatmul.msk.f32.vlgmr.msrb.gmra.mxu0 %vm185_vm0, %v1203_v7 }
  0x53   : > { %630 = vmatpush.msrb.mxu3 %v590_v53  ;;  %826 = vmatmul.msk.f32.vlgmr.msrb.gmra.mxu2 %vm185_vm0, %v1203_v7 }
  0x54   : > { %571 = vmatpush.msrb.mxu1 %v534_v54  ;;  %827 = vmatmul.msk.f32.vlgmr.msrb.gmra.mxu3 %vm185_vm0, %v1203_v7 }
  0x55   : > { %919 = vset.pattern.permute.xlu0 %v1072_v56  ;;  %666 = vmatpush.msra.mxu0 %v651_v58 }
  0x56   : > { %572 = vmatpush.msrb.mxu1 %v532_v55  ;;  %916 = vset.pattern.permute.xlu2 %v1073_v57 }
  0x57   : > { %825 = vmatmul.msk.f32.vlgmr.msrb.gmra.mxu1 %vm185_vm0, %v1203_v7  ;;  %462 = vperm.xlu0 %919, %v1203_v7  }
  0x58   : > { %352 = vperm.xlu2 %916, %v1203_v7   ;;  %922 = vset.pattern.permute.xlu1 %v1074_v60 }
  0x59   : > { %526 = vperm.xlu1 %922, %v1203_v7   ;;  %686 = vmatpush.msra.mxu1 %v652_v59 }
  0x5a   : > { %667 = vmatpush.msra.mxu0 %v649_v61 }
  0x5b   : > { %687 = vmatpush.msra.mxu1 %v650_v62 }
  0x5c   : > { %668 = vmatpush.msra.mxu0 %v647_v63 }
  0x5d   : > { %828 = vmatmul.msk.f32.vlgmr.msra.gmra.mxu0 %vm185_vm0, %v1203_v7  ;;  %688 = vmatpush.msra.mxu1 %v648_v0 }
  0x5f   : > { %924 = vset.pattern.permute.xlu0 %v1075_v1  ;;  %829 = vmatmul.msk.f32.vlgmr.msra.gmra.mxu1 %vm185_vm0, %v1203_v7 }
  0x60   : > { %918 = vset.pattern.permute.xlu2 %v1076_v2  ;;  %584 = vperm.xlu0 %924, %v1203_v7  }
  0x61   : > { %410 = vperm.xlu2 %918, %v1203_v7   ;;  %925 = vset.pattern.permute.xlu1 %v1077_v3 }
  0x62   : > { %636 = vperm.xlu1 %925, %v1203_v7  }
  0x68   : > { %929 = vset.pattern.permute.xlu0 %v1078_v4 }
  0x69   : > { %921 = vset.pattern.permute.xlu2 %v1079_v5 }
  0x6a   : > { %520 = vperm.xlu2 %921, %v1203_v7   ;;  %927 = vset.pattern.permute.xlu1 %v1080_v6 }
  0x6b   : > { %694 = vperm.xlu1 %927, %v1203_v7  }
  0x72   : > { %923 = vset.pattern.permute.xlu2 %v1081_v8 }
  0x73   : > { %578 = vperm.xlu2 %923, %v1203_v7  }
  0x7b   : > { %926 = vset.pattern.permute.xlu2 %v1082_v9 }
  0x7c   : > { %642 = vperm.xlu2 %926, %v1203_v7  }
  0x84   : > { %928 = vset.pattern.permute.xlu2 %v1078_v4 }
  0x85   : > { %700 = vperm.xlu2 %928, %v1203_v7  }
  0xa4   : > { %v289_v10 = vpop.permute.xlu1 %288 }
  0xa8   : > { %v347_v11 = vpop.permute.xlu2 %346 }
  0xab   : > { %v231_v12 = vpop.permute.xlu0 %230 }
  0xae   : > { %v295_v13 = vpop.permute.xlu1 %294 }
  0xb2   : > { %v353_v14 = vpop.permute.xlu2 %352 }
  0xb4   : > { %v206_v15 = vpop.f32.mrf.mxu0  ;;  %v226_v16 = vpop.f32.mrf.mxu1 }
  0xb5   : > { %v237_v17 = vpop.permute.xlu0 %236  ;;  %v233_v18 = vmul.f32 %v231_v12, %v206_v15 }
  0xb6   : > { %v239_v19 = vmul.f32 %v237_v17, %v226_v16 }
  0xb8   : > { %v405_v20 = vpop.permute.xlu1 %404  ;;  %v240_v23 = vadd.f32 %v239_v19, %v233_v18 }
  0xbb   : > { %v411_v21 = vpop.permute.xlu2 %410  ;;  %v264_v22 = vpop.f32.mrf.mxu2 }
  0xbc   : > { %v291_v24 = vmul.f32 %v289_v10, %v264_v22  ;;  %v284_v25 = vpop.f32.mrf.mxu3 }
  0xbd   : > { %v297_v27 = vmul.f32 %v295_v13, %v284_v25  ;;  %v322_v28 = vpop.f32.mrf.mxu0 }
  0xbe   : > { %v292_v26 = vadd.f32 %v291_v24, %v240_v23  ;;  %v342_v7 = vpop.f32.mrf.mxu1  ;;  %v349_v30 = vmul.f32 %v347_v11, %v322_v28 }
  0xbf   : > { %v355_v32 = vmul.f32 %v353_v14, %v342_v7 }
  0xc0   : > { %v298_v29 = vadd.f32 %v297_v27, %v292_v26 }
  0xc2   : > { %v350_v31 = vadd.f32 %v349_v30, %v298_v29  ;;  %v469_v33 = vpop.permute.xlu1 %468 }
  0xc4   : > { %v356_v34 = vadd.f32 %v355_v32, %v350_v31  ;;  %v521_v35 = vpop.permute.xlu2 %520  ;;  %v380_v36 = vpop.f32.mrf.mxu2 }
  0xc5   : > { %v400_v37 = vpop.f32.mrf.mxu3  ;;  %v407_v38 = vmul.f32 %v405_v20, %v380_v36 }
  0xc6   : > { %v413_v40 = vmul.f32 %v411_v21, %v400_v37 }
  0xc7   : > { %v408_v39 = vadd.f32 %v407_v38, %v356_v34  ;;  %v438_v41 = vpop.f32.mrf.mxu0 }
  0xc8   : > { %v458_v42 = vpop.f32.mrf.mxu1 }
  0xc9   : > { %v463_v43 = vpop.permute.xlu0 %462  ;;  %v414_v44 = vadd.f32 %v413_v40, %v408_v39  ;;  %v471_v47 = vmul.f32 %v469_v33, %v458_v42 }
  0xca   : > { %v465_v45 = vmul.f32 %v463_v43, %v438_v41 }
  0xcb   : > { %v527_v46 = vpop.permute.xlu1 %526 }
  0xcc   : > { %v466_v48 = vadd.f32 %v465_v45, %v414_v44 }
  0xcd   : > { %v579_v49 = vpop.permute.xlu2 %578 }
  0xce   : > { %v472_v50 = vadd.f32 %v471_v47, %v466_v48  ;;  %v496_v51 = vpop.f32.mrf.mxu2 }
  0xcf   : > { %v516_v52 = vpop.f32.mrf.mxu3  ;;  %v523_v53 = vmul.f32 %v521_v35, %v496_v51  ;;  %v554_v54 = vpop.f32.mrf.mxu0 }
  0xd0   : > { %v529_v56 = vmul.f32 %v527_v46, %v516_v52  ;;  %v581_v59 = vmul.f32 %v579_v49, %v554_v54 }
  0xd1   : > { %v524_v55 = vadd.f32 %v523_v53, %v472_v50 }
  0xd2   : > { %v585_v57 = vpop.permute.xlu0 %584 }
  0xd3   : > { %v530_v58 = vadd.f32 %v529_v56, %v524_v55 }
  0xd4   : > { %v574_v60 = vpop.f32.mrf.mxu1  ;;  %v637_v61 = vpop.permute.xlu1 %636 }
  0xd5   : > { %v587_v62 = vmul.f32 %v585_v57, %v574_v60  ;;  %v582_v63 = vadd.f32 %v581_v59, %v530_v58 }
  0xd6   : > { %v643_v0 = vpop.permute.xlu2 %642  ;;  %v612_v1 = vpop.f32.mrf.mxu2 }
  0xd7   : > { %v588_v2 = vadd.f32 %v587_v62, %v582_v63  ;;  %v639_v3 = vmul.f32 %v637_v61, %v612_v1  ;;  %v632_v4 = vpop.f32.mrf.mxu3 }
  0xd8   : > { %v645_v6 = vmul.f32 %v643_v0, %v632_v4 }
  0xd9   : > { %v640_v5 = vadd.f32 %v639_v3, %v588_v2 }
  0xda   : > { %v670_v8 = vpop.f32.mrf.mxu0 }
  0xdb   : > { %v646_v11 = vadd.f32 %v645_v6, %v640_v5 }
  0xdc   : > { %v690_v10 = vpop.f32.mrf.mxu1 }
  0xdd   : > { %v695_v9 = vpop.permute.xlu1 %694 }
  0xde   : > { %v697_v12 = vmul.f32 %v695_v9, %v670_v8 }
  0xdf   : > { %v701_v13 = vpop.permute.xlu2 %700 }
  0xe0   : > { %v698_v14 = vadd.f32 %v697_v12, %v646_v11  ;;  %v703_v15 = vmul.f32 %v701_v13, %v690_v10 }
  0xe2   : > { %v704_v16 = vadd.f32 %v703_v15, %v698_v14 }
  0xe4   : > { %705 = vst [vmem:[%s177_s13] sm:$0xff] %v704_v16 }
  0xe5   : > { %1017 = shalt.err (!%p1014_p9)
}
  0xe6   : > { %840 = dma.vmem_to_hbm [thread:$0]  (%p1158_p13), %s720_s14, 128, %s722_s15, %s707_s16  }
  0xe7 PF: > { %s733_s3 = sand.u32 1, %s1048_s9   ;;  %p1302_p10 = scmp.ge.s32.totalorder %s1060_s12, 2 }
  0xe8   : > { %s734_s29 = scalar_lea.sflag [#allocation4], %s733_s3 }
  0xe9   : > { %p851_p11 = pnand %p1302_p10, %p1163_p4 }
  0xeb   : > { %p852_p0 = pneg %p851_p11 }
  0xed   : > { %1043 = dma.done.wait (%p852_p0), %s734_s29, 128  }
  0xee   : > { %1045 = vsyncadd (%p852_p0), %s734_s29, 4294967168  ;;  %p16_p2 = scmp.ge.s32.totalorder %s1138_s23, 4   ;;  %s1303_s9 = smov %s1052_s10 }
  0xef   : > { %s1304_s10 = smov %s1056_s11  ;;  %s1305_s11 = smov %s1150_s26 }
  0xf0   : > { %s1306_s12 = smov %s1138_s23  ;;  %18 = sbr.rel (!%p16_p2) target bundleno = 6 (0x6), region = 77 }
  0xf5   :  { %740 = vsyncpa [#allocation3], 1 }
  0xf6   :  { %742 = vsyncpa [#allocation3 + $0x1], 1 }
  0xf7   :  { %743 = vsyncpa [#allocation6], 1 }
  0xf8   :  { %744 = vsyncpa [#allocation4], 1 }
  0xf9   :  { %746 = vsyncpa [#allocation4 + $0x1], 1 }

// kernel: tpu_custom_call.1
= control target key start
LH: loop header
LB: loop body
LE: loop exit
PB: predicated region body
PF: predicated region fallthrough
CT: control target
= control target key end

     0   :  { %7 = vsyncpa [#allocation3], 0  ;;  %s1294_s0 = inlined_call_operand.hbm [shape: f32[16,24], index: 0, kind: input, shape index: {}]   ;;  %s1295_s1 = inlined_call_operand.hbm [shape: f32[24,2304], index: 1, kind: input, shape index: {}]   ;;  %s1296_s2 = inlined_call_operand.hbm [shape: f32[16,128], index: 2, kind: output, shape index: {}]  }
   0x1   :  { %9 = vsyncpa [#allocation3 + $0x1], 0 }
   0x2   :  { %10 = vsyncpa [#allocation6], 0 }
   0x3   :  { %11 = vsyncpa [#allocation4], 0 }
   0x4   :  { %13 = vsyncpa [#allocation4 + $0x1], 0  ;;  %s1098_s9 = smov 0   ;;  %s1100_s10 = smov 0  }
   0x5   :  { %s1102_s11 = smov 0   ;;  %s1104_s12 = smov 0  }
   0x6 LB: > { %s108_s15 = sshll.u32 %s1295_s1, 4  ;;  %s1122_s16 = sadd.s32 4294967295, %s1060_s12   ;;  %s1060_s12 = sphi %s1104_s12, %s1306_s12   ;;  %s1056_s11 = sphi %s1102_s11, %s1305_s11   ;;  %s1052_s10 = sphi %s1100_s10, %s1304_s10   ;;  %s1048_s9 = sphi %s1098_s9, %s1303_s9   ;;  %s109_s15 = int_to_ptr.hbm [resolvable:$true] %s108_s15 }
   0x7   : > { %p803_p0 = scmp.ge.s32.totalorder %s1060_s12, 1  ;;  %p40_p1 = scmp.eq.s32.totalorder %s1122_s16, 0 }
   0x8   : > { %p97_p2 = scmp.lt.s32.totalorder %s1060_s12, 3  ;;  %s1062_s18 = smov [#allocation5]  }
   0x9   : > { %s110_s19 = sshll.u32 %s1062_s18, 4  ;;  %s1063_s20 = smov 2304   ;;  %s111_s19 = int_to_ptr.vmem [resolvable:$true] %s110_s19 }
   0xa   : > { %p1127_p3 = pnand %p803_p0, %p97_p2  ;;  %s1064_s21 = smov 144  }
   0xb   : > { %s802_s22 = sadd.s32 4294967294, %s1060_s12   ;;  %s1138_s23 = sadd.s32 1, %s1060_s12  }
   0xc   : > { %p842_p4 = pneg %p1127_p3  ;;  %s26_s24 = sadd.s32 1, %s1056_s11 }
   0xd   : > { %s23_s25 = ssub.s32 %s1060_s12, %s1138_s23  ;;  %p33_p7 = scmp.ne.s32.totalorder %s1056_s11, %s1052_s10 }
   0xe   : > { %p843_p6 = pnand %p842_p4, %p40_p1  ;;  %p24_p8 = scmp.eq.s32.totalorder %s23_s25, 0 }
   0xf   : > { %p34_p9 = scmp.eq.s32.totalorder %s1060_s12, 0  ;;  %p39_p10 = scmp.ne.s32.totalorder %s1052_s10, %s1048_s9 }
  0x10   : > { %845 = dma.hbm_to_vmem [thread:$0]  (!%p843_p6), %s109_s15, 6912, %s111_s19, [#allocation6], %s1063_s20, %s1063_s20, %s1064_s21  }
  0x11   : > { %p84_p11 = scmp.eq.s32.totalorder %s1122_s16, 1  ;;  %p1154_p12 = por %p40_p1, %p39_p10 }
  0x12   : > { %s1150_s26 = scalar_select %p24_p8, %s1056_s11, %s26_s24  }
  0x13   : > { %p1158_p13 = por %p84_p11, %p33_p7  ;;  %p90_p0 = scmp.eq.s32.totalorder %s802_s22, 1 }
  0x14   : > { %p35_p2 = por %p34_p9, %p33_p7  ;;  %s124_s29 = sand.u32 1, %s1056_s11  }
  0x15   : > { %p1163_p4 = por %p90_p0, %p39_p10  ;;  %p855_p6 = scmp.lt.s32.totalorder %s1060_s12, 2 }
  0x16   : > { %s806_s3 = sshll.u32 %s124_s29, 3  ;;  %s807_s4 = sshll.u32 %s1060_s12, 3 }
  0x17   : > { %s132_s7 = scalar_lea.hbm %s1294_s0, %s807_s4  ;;  %s128_s13 = scalar_lea.vmem [#allocation2], %s806_s3 }
  0x18   : > { %s134_s8 = sshll.u32 %s132_s7, 4  ;;  %s136_s14 = sshll.u32 %s128_s13, 4  ;;  %s135_s8 = int_to_ptr.hbm [resolvable:$true] %s134_s8  ;;  %s137_s14 = int_to_ptr.vmem [resolvable:$true] %s136_s14 }
  0x19   : > { %p1172_p8 = pnand %p855_p6, %p35_p2  ;;  %s125_s18 = scalar_lea.sflag [#allocation3], %s124_s29 }
  0x1a   : > { %s960_s19 = sshra.s32 %s135_s8, 4  ;;  %s967_s24 = scalar_lea.hbm %s1294_s0, 16  ;;  %s961_s19 = int_to_ptr.hbm [resolvable:$true] %s960_s19 }
  0x1b   : > { %s962_s20 = scalar_lea.hbm %s961_s19, 8  ;;  %p964_p9 = pneg %p1172_p8 }
  0x1c   : > { %p963_p7 = scmp.ne.s32.totalorder %s961_s19, %s962_s20  ;;  %p968_p0 = scmp.lt.s32.totalorder %s961_s19, %s1294_s0 }
  0x1d   : > { %p969_p2 = scmp.lt.s32.totalorder %s967_s24, %s962_s20 }
  0x1e   : > { %p965_p10 = pnand %p964_p9, %p963_p7 }
  0x1f   : > { %p970_p6 = por %p969_p2, %p968_p0 }
  0x20   : > { %p966_p11 = pneg %p965_p10 }
  0x22   : > { %p971_p5 = pnand %p970_p6, %p966_p11 }
  0x24   : > { %974 = shalt.err (!%p971_p5)
}
  0x25   : > { %849 = dma.hbm_to_vmem [thread:$0]  (!%p1172_p8), %s135_s8, 128, %s137_s14, %s125_s18  }
  0x26   : > { %145 = sbr.rel (%p1127_p3) target bundleno = 231 (0xe7), region = 28  ;;  %s1189_s29 = sand.u32 (!%p1127_p3), 1, %s1052_s10  }
  0x27   : > { %s809_s4 = sshll.u32 (!%p1127_p3), %s1189_s29, 3  ;;  %s148_s5 = scalar_lea.sflag (!%p1127_p3), [#allocation3], %s1189_s29 }
  0x28   : > { %s151_s6 = scalar_lea.vmem (!%p1127_p3), [#allocation2], %s809_s4 }
  0x2b   : > { %1035 = dma.done.wait (%p1154_p12), %s148_s5, 128  }
  0x2c   : > { %1037 = vsyncadd (%p1154_p12), %s148_s5, 4294967168 }
  0x2d   : > { %1039 = dma.done.wait (%p40_p1), [#allocation6], 6912  }
  0x2e   : > { %1041 = vsyncadd (%p40_p1), [#allocation6], 4294960384  ;;  %v1065_v0 = vmov 2   ;;  %v1066_v1 = vmov 0   ;;  %v1067_v2 = vmov 4   ;;  %v183_v3 = vld [vmem:[#allocation5 + $0x120] sm:$0xff] }
  0x2f   : > { %913 = vset.pattern.permute.xlu1 %v1065_v0  ;;  %911 = vset.pattern.permute.xlu0 %v1066_v1  ;;  %v184_v4 = vld [vmem:[#allocation5 + $0x128] sm:$0xff]  ;;  %v245_v5 = vld [vmem:[#allocation5 + $0x130] sm:$0xff]  ;;  %v246_v6 = vld [vmem:[#allocation5 + $0x138] sm:$0xff]  ;;  %vm185_vm0 = vcmask 195584   ;;  %v1068_v24 = vmov 3   ;;  %v1069_v33 = vmov 1  }
  0x30   : > { %915 = vset.pattern.permute.xlu2 %v1067_v2  ;;  %202 = vmatpush.msra.mxu0 %v183_v3  ;;  %v1203_v7 = vld [vmem:[%s151_s6] sm:$0xff]  ;;  %v243_v10 = vld [vmem:[#allocation5 + $0xa0] sm:$0xff]  ;;  %v244_v11 = vld [vmem:[#allocation5 + $0xa8] sm:$0xff]  ;;  %v1070_v38 = vmov 6   ;;  %v1071_v50 = vmov 9   ;;  %v1072_v56 = vmov 8  }
  0x31   : > { %222 = vmatpush.msra.mxu1 %v184_v4  ;;  %v181_v8 = vld [vmem:[#allocation5 + $0x90] sm:$0xff]  ;;  %260 = vmatpush.msra.mxu2 %v245_v5  ;;  %v182_v9 = vld [vmem:[#allocation5 + $0x98] sm:$0xff]  ;;  %v179_v12 = vld [vmem:[#allocation5] sm:$0xff]  ;;  %v1073_v57 = vmov 5   ;;  %v1074_v60 = vmov 11   ;;  %v1075_v1 = vmov 13  }
  0x32   : > { %280 = vmatpush.msra.mxu3 %v246_v6  ;;  %288 = vperm.xlu1 %913, %v1203_v7   ;;  %v180_v13 = vld [vmem:[#allocation5 + $0x8] sm:$0xff]  ;;  %v241_v14 = vld [vmem:[#allocation5 + $0x10] sm:$0xff]  ;;  %v242_v15 = vld [vmem:[#allocation5 + $0x18] sm:$0xff]  ;;  %v1076_v2 = vmov 7   ;;  %v1077_v3 = vmov 14   ;;  %v1078_v4 = vmov 17  }
  0x33   : > { %203 = vmatpush.msra.mxu0 %v181_v8  ;;  %223 = vmatpush.msra.mxu1 %v182_v9  ;;  %v303_v16 = vld [vmem:[#allocation5 + $0x140] sm:$0xff]  ;;  %v304_v17 = vld [vmem:[#allocation5 + $0x148] sm:$0xff]  ;;  %v361_v18 = vld [vmem:[#allocation5 + $0x150] sm:$0xff]  ;;  %v1079_v5 = vmov 10   ;;  %v1080_v6 = vmov 16   ;;  %v1081_v8 = vmov 12  }
  0x34   : > { %261 = vmatpush.msra.mxu2 %v243_v10  ;;  %281 = vmatpush.msra.mxu3 %v244_v11  ;;  %v362_v19 = vld [vmem:[#allocation5 + $0x158] sm:$0xff]  ;;  %v301_v20 = vld [vmem:[#allocation5 + $0xb0] sm:$0xff]  ;;  %v359_v22 = vld [vmem:[#allocation5 + $0xc0] sm:$0xff]  ;;  %v1082_v9 = vmov 15   ;;  %s831_s17 = sshll.u32 %s1122_s16, 3  ;;  %s177_s13 = scalar_lea.vmem [#allocation7], %s809_s4 }
  0x35   : > { %204 = vmatpush.msra.mxu0 %v179_v12  ;;  %224 = vmatpush.msra.mxu1 %v180_v13  ;;  %v302_v21 = vld [vmem:[#allocation5 + $0xb8] sm:$0xff]  ;;  %v360_v23 = vld [vmem:[#allocation5 + $0xc8] sm:$0xff]  ;;  %v299_v25 = vld [vmem:[#allocation5 + $0x20] sm:$0xff]  ;;  %s717_s8 = scalar_lea.hbm %s1296_s2, %s831_s17  ;;  %s719_s14 = sshll.u32 %s177_s13, 4  ;;  %s720_s14 = int_to_ptr.vmem [resolvable:$true] %s719_s14 }
  0x36   : > { %262 = vmatpush.msra.mxu2 %v241_v14  ;;  %282 = vmatpush.msra.mxu3 %v242_v15  ;;  %v300_v26 = vld [vmem:[#allocation5 + $0x28] sm:$0xff]  ;;  %v357_v27 = vld [vmem:[#allocation5 + $0x30] sm:$0xff]  ;;  %v358_v28 = vld [vmem:[#allocation5 + $0x38] sm:$0xff]  ;;  %s721_s15 = sshll.u32 %s717_s8, 4  ;;  %s707_s16 = scalar_lea.sflag [#allocation4], %s1189_s29  ;;  %s722_s15 = int_to_ptr.hbm [resolvable:$true] %s721_s15 }
  0x37   : > { %812 = vmatmul.msk.f32.vlgmr.msra.gmra.mxu0 %vm185_vm0, %v1203_v7  ;;  %813 = vmatmul.msk.f32.vlgmr.msra.gmra.mxu1 %vm185_vm0, %v1203_v7  ;;  %v419_v29 = vld [vmem:[#allocation5 + $0x160] sm:$0xff]  ;;  %v420_v30 = vld [vmem:[#allocation5 + $0x168] sm:$0xff]  ;;  %v477_v31 = vld [vmem:[#allocation5 + $0x170] sm:$0xff]  ;;  %s1004_s18 = sshra.s32 %s722_s15, 4  ;;  %s1010_s22 = scalar_lea.hbm %s1296_s2, 16  ;;  %s1005_s18 = int_to_ptr.hbm [resolvable:$true] %s1004_s18 }
  0x38   : > { %814 = vmatmul.msk.f32.vlgmr.msra.gmra.mxu2 %vm185_vm0, %v1203_v7  ;;  %815 = vmatmul.msk.f32.vlgmr.msra.gmra.mxu3 %vm185_vm0, %v1203_v7  ;;  %v478_v32 = vld [vmem:[#allocation5 + $0x178] sm:$0xff]  ;;  %v417_v34 = vld [vmem:[#allocation5 + $0xd0] sm:$0xff]  ;;  %v475_v36 = vld [vmem:[#allocation5 + $0xe0] sm:$0xff]  ;;  %s1006_s19 = scalar_lea.hbm %s1005_s18, 8  ;;  %p1011_p12 = scmp.lt.s32.totalorder %s1005_s18, %s1296_s2 }
  0x39   : > { %230 = vperm.xlu0 %911, %v1203_v7   ;;  %318 = vmatpush.msrb.mxu0 %v303_v16  ;;  %v418_v35 = vld [vmem:[#allocation5 + $0xd8] sm:$0xff]  ;;  %v476_v37 = vld [vmem:[#allocation5 + $0xe8] sm:$0xff]  ;;  %v415_v39 = vld [vmem:[#allocation5 + $0x40] sm:$0xff]  ;;  %p1007_p1 = scmp.ne.s32.totalorder %s1005_s18, %s1006_s19  ;;  %p1012_p8 = scmp.lt.s32.totalorder %s1010_s22, %s1006_s19 }
  0x3a   : > { %338 = vmatpush.msrb.mxu1 %v304_v17  ;;  %376 = vmatpush.msrb.mxu2 %v361_v18  ;;  %v416_v40 = vld [vmem:[#allocation5 + $0x48] sm:$0xff]  ;;  %v473_v41 = vld [vmem:[#allocation5 + $0x50] sm:$0xff]  ;;  %v474_v42 = vld [vmem:[#allocation5 + $0x58] sm:$0xff] }
  0x3b   : > { %396 = vmatpush.msrb.mxu3 %v362_v19  ;;  %914 = vset.pattern.permute.xlu1 %v1068_v24  ;;  %v535_v43 = vld [vmem:[#allocation5 + $0x180] sm:$0xff]  ;;  %v593_v44 = vld [vmem:[#allocation5 + $0x190] sm:$0xff]  ;;  %v594_v45 = vld [vmem:[#allocation5 + $0x198] sm:$0xff]  ;;  %p1008_p3 = pnand %p1007_p1, %p1158_p13  ;;  %p1013_p7 = por %p1012_p8, %p1011_p12 }
  0x3c   : > { %319 = vmatpush.msrb.mxu0 %v301_v20  ;;  %294 = vperm.xlu1 %914, %v1203_v7   ;;  %v533_v46 = vld [vmem:[#allocation5 + $0xf0] sm:$0xff]  ;;  %v591_v47 = vld [vmem:[#allocation5 + $0x100] sm:$0xff]  ;;  %v592_v48 = vld [vmem:[#allocation5 + $0x108] sm:$0xff] }
  0x3d   : > { %339 = vmatpush.msrb.mxu1 %v302_v21  ;;  %377 = vmatpush.msrb.mxu2 %v359_v22  ;;  %v531_v49 = vld [vmem:[#allocation5 + $0x60] sm:$0xff]  ;;  %v536_v51 = vld [vmem:[#allocation5 + $0x188] sm:$0xff]  ;;  %v589_v52 = vld [vmem:[#allocation5 + $0x70] sm:$0xff]  ;;  %p1009_p5 = pneg %p1008_p3 }
  0x3e   : > { %397 = vmatpush.msrb.mxu3 %v360_v23  ;;  %320 = vmatpush.msrb.mxu0 %v299_v25  ;;  %v590_v53 = vld [vmem:[#allocation5 + $0x78] sm:$0xff]  ;;  %v532_v55 = vld [vmem:[#allocation5 + $0x68] sm:$0xff]  ;;  %v651_v58 = vld [vmem:[#allocation5 + $0x1a0] sm:$0xff] }
  0x3f   : > { %340 = vmatpush.msrb.mxu1 %v300_v26  ;;  %378 = vmatpush.msrb.mxu2 %v357_v27  ;;  %v534_v54 = vld [vmem:[#allocation5 + $0xf8] sm:$0xff]  ;;  %v652_v59 = vld [vmem:[#allocation5 + $0x1a8] sm:$0xff]  ;;  %v649_v61 = vld [vmem:[#allocation5 + $0x110] sm:$0xff]  ;;  %p1014_p9 = pnand %p1013_p7, %p1009_p5 }
  0x40   : > { %398 = vmatpush.msrb.mxu3 %v358_v28  ;;  %816 = vmatmul.msk.f32.vlgmr.msrb.gmra.mxu0 %vm185_vm0, %v1203_v7  ;;  %v650_v62 = vld [vmem:[#allocation5 + $0x118] sm:$0xff]  ;;  %v647_v63 = vld [vmem:[#allocation5 + $0x80] sm:$0xff]  ;;  %v648_v0 = vld [vmem:[#allocation5 + $0x88] sm:$0xff] }
  0x41   : > { %817 = vmatmul.msk.f32.vlgmr.msrb.gmra.mxu1 %vm185_vm0, %v1203_v7  ;;  %818 = vmatmul.msk.f32.vlgmr.msrb.gmra.mxu2 %vm185_vm0, %v1203_v7 }
  0x42   : > { %819 = vmatmul.msk.f32.vlgmr.msrb.gmra.mxu3 %vm185_vm0, %v1203_v7  ;;  %912 = vset.pattern.permute.xlu0 %v1069_v33 }
  0x43   : > { %434 = vmatpush.msra.mxu0 %v419_v29  ;;  %236 = vperm.xlu0 %912, %v1203_v7  }
  0x44   : > { %454 = vmatpush.msra.mxu1 %v420_v30  ;;  %492 = vmatpush.msra.mxu2 %v477_v31 }
  0x45   : > { %512 = vmatpush.msra.mxu3 %v478_v32  ;;  %917 = vset.pattern.permute.xlu1 %v1070_v38 }
  0x46   : > { %435 = vmatpush.msra.mxu0 %v417_v34  ;;  %404 = vperm.xlu1 %917, %v1203_v7  }
  0x47   : > { %455 = vmatpush.msra.mxu1 %v418_v35  ;;  %493 = vmatpush.msra.mxu2 %v475_v36 }
  0x48   : > { %513 = vmatpush.msra.mxu3 %v476_v37  ;;  %436 = vmatpush.msra.mxu0 %v415_v39 }
  0x49   : > { %456 = vmatpush.msra.mxu1 %v416_v40  ;;  %494 = vmatpush.msra.mxu2 %v473_v41 }
  0x4a   : > { %514 = vmatpush.msra.mxu3 %v474_v42  ;;  %820 = vmatmul.msk.f32.vlgmr.msra.gmra.mxu0 %vm185_vm0, %v1203_v7 }
  0x4b   : > { %821 = vmatmul.msk.f32.vlgmr.msra.gmra.mxu1 %vm185_vm0, %v1203_v7  ;;  %822 = vmatmul.msk.f32.vlgmr.msra.gmra.mxu2 %vm185_vm0, %v1203_v7 }
  0x4c   : > { %823 = vmatmul.msk.f32.vlgmr.msra.gmra.mxu3 %vm185_vm0, %v1203_v7  ;;  %550 = vmatpush.msrb.mxu0 %v535_v43 }
  0x4d   : > { %608 = vmatpush.msrb.mxu2 %v593_v44  ;;  %628 = vmatpush.msrb.mxu3 %v594_v45 }
  0x4e   : > { %346 = vperm.xlu2 %915, %v1203_v7   ;;  %920 = vset.pattern.permute.xlu1 %v1071_v50 }
  0x4f   : > { %551 = vmatpush.msrb.mxu0 %v533_v46  ;;  %609 = vmatpush.msrb.mxu2 %v591_v47 }
  0x50   : > { %468 = vperm.xlu1 %920, %v1203_v7   ;;  %629 = vmatpush.msrb.mxu3 %v592_v48 }
  0x51   : > { %552 = vmatpush.msrb.mxu0 %v531_v49  ;;  %570 = vmatpush.msrb.mxu1 %v536_v51 }
  0x52   : > { %610 = vmatpush.msrb.mxu2 %v589_v52  ;;  %824 = vmatmul.msk.f32.vlgmr.msrb.gmra.mxu0 %vm185_vm0, %v1203_v7 }
  0x53   : > { %630 = vmatpush.msrb.mxu3 %v590_v53  ;;  %826 = vmatmul.msk.f32.vlgmr.msrb.gmra.mxu2 %vm185_vm0, %v1203_v7 }
  0x54   : > { %571 = vmatpush.msrb.mxu1 %v534_v54  ;;  %827 = vmatmul.msk.f32.vlgmr.msrb.gmra.mxu3 %vm185_vm0, %v1203_v7 }
  0x55   : > { %919 = vset.pattern.permute.xlu0 %v1072_v56  ;;  %666 = vmatpush.msra.mxu0 %v651_v58 }
  0x56   : > { %572 = vmatpush.msrb.mxu1 %v532_v55  ;;  %916 = vset.pattern.permute.xlu2 %v1073_v57 }
  0x57   : > { %825 = vmatmul.msk.f32.vlgmr.msrb.gmra.mxu1 %vm185_vm0, %v1203_v7  ;;  %462 = vperm.xlu0 %919, %v1203_v7  }
  0x58   : > { %352 = vperm.xlu2 %916, %v1203_v7   ;;  %922 = vset.pattern.permute.xlu1 %v1074_v60 }
  0x59   : > { %526 = vperm.xlu1 %922, %v1203_v7   ;;  %686 = vmatpush.msra.mxu1 %v652_v59 }
  0x5a   : > { %667 = vmatpush.msra.mxu0 %v649_v61 }
  0x5b   : > { %687 = vmatpush.msra.mxu1 %v650_v62 }
  0x5c   : > { %668 = vmatpush.msra.mxu0 %v647_v63 }
  0x5d   : > { %828 = vmatmul.msk.f32.vlgmr.msra.gmra.mxu0 %vm185_vm0, %v1203_v7  ;;  %688 = vmatpush.msra.mxu1 %v648_v0 }
  0x5f   : > { %924 = vset.pattern.permute.xlu0 %v1075_v1  ;;  %829 = vmatmul.msk.f32.vlgmr.msra.gmra.mxu1 %vm185_vm0, %v1203_v7 }
  0x60   : > { %918 = vset.pattern.permute.xlu2 %v1076_v2  ;;  %584 = vperm.xlu0 %924, %v1203_v7  }
  0x61   : > { %410 = vperm.xlu2 %918, %v1203_v7   ;;  %925 = vset.pattern.permute.xlu1 %v1077_v3 }
  0x62   : > { %636 = vperm.xlu1 %925, %v1203_v7  }
  0x68   : > { %929 = vset.pattern.permute.xlu0 %v1078_v4 }
  0x69   : > { %921 = vset.pattern.permute.xlu2 %v1079_v5 }
  0x6a   : > { %520 = vperm.xlu2 %921, %v1203_v7   ;;  %927 = vset.pattern.permute.xlu1 %v1080_v6 }
  0x6b   : > { %694 = vperm.xlu1 %927, %v1203_v7  }
  0x72   : > { %923 = vset.pattern.permute.xlu2 %v1081_v8 }
  0x73   : > { %578 = vperm.xlu2 %923, %v1203_v7  }
  0x7b   : > { %926 = vset.pattern.permute.xlu2 %v1082_v9 }
  0x7c   : > { %642 = vperm.xlu2 %926, %v1203_v7  }
  0x84   : > { %928 = vset.pattern.permute.xlu2 %v1078_v4 }
  0x85   : > { %700 = vperm.xlu2 %928, %v1203_v7  }
  0xa4   : > { %v289_v10 = vpop.permute.xlu1 %288 }
  0xa8   : > { %v347_v11 = vpop.permute.xlu2 %346 }
  0xab   : > { %v231_v12 = vpop.permute.xlu0 %230 }
  0xae   : > { %v295_v13 = vpop.permute.xlu1 %294 }
  0xb2   : > { %v353_v14 = vpop.permute.xlu2 %352 }
  0xb4   : > { %v206_v15 = vpop.f32.mrf.mxu0  ;;  %v226_v16 = vpop.f32.mrf.mxu1 }
  0xb5   : > { %v237_v17 = vpop.permute.xlu0 %236  ;;  %v233_v18 = vmul.f32 %v231_v12, %v206_v15 }
  0xb6   : > { %v239_v19 = vmul.f32 %v237_v17, %v226_v16 }
  0xb8   : > { %v405_v20 = vpop.permute.xlu1 %404  ;;  %v240_v23 = vadd.f32 %v239_v19, %v233_v18 }
  0xbb   : > { %v411_v21 = vpop.permute.xlu2 %410  ;;  %v264_v22 = vpop.f32.mrf.mxu2 }
  0xbc   : > { %v291_v24 = vmul.f32 %v289_v10, %v264_v22  ;;  %v284_v25 = vpop.f32.mrf.mxu3 }
  0xbd   : > { %v297_v27 = vmul.f32 %v295_v13, %v284_v25  ;;  %v322_v28 = vpop.f32.mrf.mxu0 }
  0xbe   : > { %v292_v26 = vadd.f32 %v291_v24, %v240_v23  ;;  %v342_v7 = vpop.f32.mrf.mxu1  ;;  %v349_v30 = vmul.f32 %v347_v11, %v322_v28 }
  0xbf   : > { %v355_v32 = vmul.f32 %v353_v14, %v342_v7 }
  0xc0   : > { %v298_v29 = vadd.f32 %v297_v27, %v292_v26 }
  0xc2   : > { %v350_v31 = vadd.f32 %v349_v30, %v298_v29  ;;  %v469_v33 = vpop.permute.xlu1 %468 }
  0xc4   : > { %v356_v34 = vadd.f32 %v355_v32, %v350_v31  ;;  %v521_v35 = vpop.permute.xlu2 %520  ;;  %v380_v36 = vpop.f32.mrf.mxu2 }
  0xc5   : > { %v400_v37 = vpop.f32.mrf.mxu3  ;;  %v407_v38 = vmul.f32 %v405_v20, %v380_v36 }
  0xc6   : > { %v413_v40 = vmul.f32 %v411_v21, %v400_v37 }
  0xc7   : > { %v408_v39 = vadd.f32 %v407_v38, %v356_v34  ;;  %v438_v41 = vpop.f32.mrf.mxu0 }
  0xc8   : > { %v458_v42 = vpop.f32.mrf.mxu1 }
  0xc9   : > { %v463_v43 = vpop.permute.xlu0 %462  ;;  %v414_v44 = vadd.f32 %v413_v40, %v408_v39  ;;  %v471_v47 = vmul.f32 %v469_v33, %v458_v42 }
  0xca   : > { %v465_v45 = vmul.f32 %v463_v43, %v438_v41 }
  0xcb   : > { %v527_v46 = vpop.permute.xlu1 %526 }
  0xcc   : > { %v466_v48 = vadd.f32 %v465_v45, %v414_v44 }
  0xcd   : > { %v579_v49 = vpop.permute.xlu2 %578 }
  0xce   : > { %v472_v50 = vadd.f32 %v471_v47, %v466_v48  ;;  %v496_v51 = vpop.f32.mrf.mxu2 }
  0xcf   : > { %v516_v52 = vpop.f32.mrf.mxu3  ;;  %v523_v53 = vmul.f32 %v521_v35, %v496_v51  ;;  %v554_v54 = vpop.f32.mrf.mxu0 }
  0xd0   : > { %v529_v56 = vmul.f32 %v527_v46, %v516_v52  ;;  %v581_v59 = vmul.f32 %v579_v49, %v554_v54 }
  0xd1   : > { %v524_v55 = vadd.f32 %v523_v53, %v472_v50 }
  0xd2   : > { %v585_v57 = vpop.permute.xlu0 %584 }
  0xd3   : > { %v530_v58 = vadd.f32 %v529_v56, %v524_v55 }
  0xd4   : > { %v574_v60 = vpop.f32.mrf.mxu1  ;;  %v637_v61 = vpop.permute.xlu1 %636 }
  0xd5   : > { %v587_v62 = vmul.f32 %v585_v57, %v574_v60  ;;  %v582_v63 = vadd.f32 %v581_v59, %v530_v58 }
  0xd6   : > { %v643_v0 = vpop.permute.xlu2 %642  ;;  %v612_v1 = vpop.f32.mrf.mxu2 }
  0xd7   : > { %v588_v2 = vadd.f32 %v587_v62, %v582_v63  ;;  %v639_v3 = vmul.f32 %v637_v61, %v612_v1  ;;  %v632_v4 = vpop.f32.mrf.mxu3 }
  0xd8   : > { %v645_v6 = vmul.f32 %v643_v0, %v632_v4 }
  0xd9   : > { %v640_v5 = vadd.f32 %v639_v3, %v588_v2 }
  0xda   : > { %v670_v8 = vpop.f32.mrf.mxu0 }
  0xdb   : > { %v646_v11 = vadd.f32 %v645_v6, %v640_v5 }
  0xdc   : > { %v690_v10 = vpop.f32.mrf.mxu1 }
  0xdd   : > { %v695_v9 = vpop.permute.xlu1 %694 }
  0xde   : > { %v697_v12 = vmul.f32 %v695_v9, %v670_v8 }
  0xdf   : > { %v701_v13 = vpop.permute.xlu2 %700 }
  0xe0   : > { %v698_v14 = vadd.f32 %v697_v12, %v646_v11  ;;  %v703_v15 = vmul.f32 %v701_v13, %v690_v10 }
  0xe2   : > { %v704_v16 = vadd.f32 %v703_v15, %v698_v14 }
  0xe4   : > { %705 = vst [vmem:[%s177_s13] sm:$0xff] %v704_v16 }
  0xe5   : > { %1017 = shalt.err (!%p1014_p9)
}
  0xe6   : > { %840 = dma.vmem_to_hbm [thread:$0]  (%p1158_p13), %s720_s14, 128, %s722_s15, %s707_s16  }
  0xe7 PF: > { %s733_s3 = sand.u32 1, %s1048_s9   ;;  %p1302_p10 = scmp.ge.s32.totalorder %s1060_s12, 2 }
  0xe8   : > { %s734_s29 = scalar_lea.sflag [#allocation4], %s733_s3 }
  0xe9   : > { %p851_p11 = pnand %p1302_p10, %p1163_p4 }
  0xeb   : > { %p852_p0 = pneg %p851_p11 }
  0xed   : > { %1043 = dma.done.wait (%p852_p0), %s734_s29, 128  }
  0xee   : > { %1045 = vsyncadd (%p852_p0), %s734_s29, 4294967168  ;;  %p16_p2 = scmp.ge.s32.totalorder %s1138_s23, 4   ;;  %s1303_s9 = smov %s1052_s10 }
  0xef   : > { %s1304_s10 = smov %s1056_s11  ;;  %s1305_s11 = smov %s1150_s26 }
  0xf0   : > { %s1306_s12 = smov %s1138_s23  ;;  %18 = sbr.rel (!%p16_p2) target bundleno = 6 (0x6), region = 77 }
  0xf5   :  { %740 = vsyncpa [#allocation3], 1 }
  0xf6   :  { %742 = vsyncpa [#allocation3 + $0x1], 1 }
  0xf7   :  { %743 = vsyncpa [#allocation6], 1 }
  0xf8   :  { %744 = vsyncpa [#allocation4], 1 }
  0xf9   :  { %746 = vsyncpa [#allocation4 + $0x1], 1 }

</bundles_post_ra>
